<compile_context>
chip_gen: v7x
topology: tpu7x:2x2x1
jax: 0.10.0
libtpu: 0.0.40
codegen_flags: <defaults>
</compile_context>

<pallas_src>
import functools

import jax
import jax.numpy as jnp
from jax.experimental import pallas as pl
from jax.experimental.pallas import tpu as pltpu

EPS = 1e-5  # PyTorch BatchNorm2d default


# --------------------------------------------------------------------------
# Kernels
# --------------------------------------------------------------------------
def _dsconv_kernel(x_ref, scale_ref, shift_ref, wfold_ref,
                   y_ref, ssum_ref, ssq_ref,
                   xpad_ref, *, apply_prologue, compute_dtype):
    """(optional BN-apply+ReLU prologue) -> depthwise-separable 3x3 conv
    (tap-folded, all MXU) -> per-channel sum / sumsq accumulation.

    x_ref     : (bn, H, W, Cin)      input activation block (NHWC)
    scale_ref : (1, Cin)             prologue BN scale  (gamma * rsqrt(var+eps))
    shift_ref : (1, Cin)             prologue BN shift  (beta - mean*scale)
    wfold_ref : (9, Cin, Cout)       depthwise taps folded into pointwise weights
    y_ref     : (bn, H, W, Cout)     conv output block (pre-BN)
    ssum_ref  : (1, Cout)            running sum   of y over (N,H,W)  [f32 accumulator]
    ssq_ref   : (1, Cout)            running sumsq of y over (N,H,W)  [f32 accumulator]
    xpad_ref  : (bn, H+2, W+2, Cin)  VMEM scratch with a zero halo border
    """
    bn, H, W, Cin = x_ref.shape
    Cout = wfold_ref.shape[2]
    step = pl.program_id(0)

    @pl.when(step == 0)
    def _init():
        # Zero the halo border once (the interior is fully rewritten each step)
        # and initialize the resident stat accumulators.
        xpad_ref[...] = jnp.zeros_like(xpad_ref)
        ssum_ref[...] = jnp.zeros_like(ssum_ref)
        ssq_ref[...] = jnp.zeros_like(ssq_ref)

    x = x_ref[...].astype(jnp.float32)
    if apply_prologue:
        # Previous layer's BN (batch statistics) + ReLU applied on the fly so
        # the post-activation never round-trips through HBM.
        x = (x * scale_ref[...].reshape(1, 1, 1, Cin)
             + shift_ref[...].reshape(1, 1, 1, Cin))
        x = jnp.maximum(x, 0.0)
    xpad_ref[:, 1:H + 1, 1:W + 1, :] = x

    wf = wfold_ref[...].astype(compute_dtype)

    # 9 shifted reads, each feeding an MXU matmul, accumulated in f32.
    acc = jnp.zeros((bn * H * W, Cout), jnp.float32)
    for dh in range(3):
        for dw in range(3):
            xs = xpad_ref[:, dh:dh + H, dw:dw + W, :].astype(compute_dtype)
            acc = acc + jnp.dot(xs.reshape(bn * H * W, Cin),
                                wf[dh * 3 + dw],
                                preferred_element_type=jnp.float32)

    y_ref[...] = acc.reshape(bn, H, W, Cout).astype(y_ref.dtype)

    # BN statistics of this conv's output (kept in f32).
    ssum_ref[...] += jnp.sum(acc, axis=0, keepdims=True)
    ssq_ref[...] += jnp.sum(acc * acc, axis=0, keepdims=True)


def _bn_relu_apply_kernel(y_ref, scale_ref, shift_ref, o_ref):
    """Apply precomputed BN affine (batch stats) + ReLU: o = max(y*scale+shift, 0)."""
    C = y_ref.shape[-1]
    y = y_ref[...].astype(jnp.float32)
    z = (y * scale_ref[...].reshape(1, 1, 1, C)
         + shift_ref[...].reshape(1, 1, 1, C))
    o_ref[...] = jnp.maximum(z, 0.0).astype(o_ref.dtype)


# --------------------------------------------------------------------------
# Pallas wrappers
# --------------------------------------------------------------------------
def _dsconv_bn_stats(x_nhwc, wfold, scale, shift, *, apply_prologue,
                     compute_dtype, block_n):
    N, H, W, Cin = x_nhwc.shape
    Cout = wfold.shape[2]
    bn = min(block_n, N)
    assert N % bn == 0, (N, bn)
    kernel = functools.partial(_dsconv_kernel,
                               apply_prologue=apply_prologue,
                               compute_dtype=compute_dtype)
    return pl.pallas_call(
        kernel,
        grid=(N // bn,),
        in_specs=[
            pl.BlockSpec((bn, H, W, Cin), lambda i: (i, 0, 0, 0)),
            pl.BlockSpec((1, Cin), lambda i: (0, 0)),
            pl.BlockSpec((1, Cin), lambda i: (0, 0)),
            pl.BlockSpec((9, Cin, Cout), lambda i: (0, 0, 0)),
        ],
        out_specs=(
            pl.BlockSpec((bn, H, W, Cout), lambda i: (i, 0, 0, 0)),
            pl.BlockSpec((1, Cout), lambda i: (0, 0)),   # resident accumulator
            pl.BlockSpec((1, Cout), lambda i: (0, 0)),   # resident accumulator
        ),
        out_shape=(
            jax.ShapeDtypeStruct((N, H, W, Cout), x_nhwc.dtype),
            jax.ShapeDtypeStruct((1, Cout), jnp.float32),
            jax.ShapeDtypeStruct((1, Cout), jnp.float32),
        ),
        scratch_shapes=[pltpu.VMEM((bn, H + 2, W + 2, Cin), jnp.float32)],
        # This grid axis carries the BN-stat reduction (constant-index
        # accumulator outputs) -> "arbitrary".  For v7x dual-TC sharding,
        # switch stats to per-block partials and mark it "parallel".
        compiler_params=pltpu.CompilerParams(
            dimension_semantics=("arbitrary",)),
    )(x_nhwc, scale, shift, wfold)


def _bn_relu_apply(y_nhwc, scale, shift, *, block_n):
    N, H, W, C = y_nhwc.shape
    bn = min(block_n, N)
    assert N % bn == 0, (N, bn)
    return pl.pallas_call(
        _bn_relu_apply_kernel,
        grid=(N // bn,),
        in_specs=[
            pl.BlockSpec((bn, H, W, C), lambda i: (i, 0, 0, 0)),
            pl.BlockSpec((1, C), lambda i: (0, 0)),
            pl.BlockSpec((1, C), lambda i: (0, 0)),
        ],
        out_specs=pl.BlockSpec((bn, H, W, C), lambda i: (i, 0, 0, 0)),
        out_shape=jax.ShapeDtypeStruct((N, H, W, C), y_nhwc.dtype),
        compiler_params=pltpu.CompilerParams(
            dimension_semantics=("parallel",)),
    )(y_nhwc, scale, shift)


# --------------------------------------------------------------------------
# Parameter preparation (tiny host/XLA-side math)
# --------------------------------------------------------------------------
def _fold_weights(wd_torch, wp_torch):
    """Fold torch depthwise (Cin,1,3,3) + pointwise (Cout,Cin,1,1) weights into
    9 channel-matmul matrices Wk[c,co] = wd[k,c] * wp[c,co]  -> (9, Cin, Cout)."""
    cin = wd_torch.shape[0]
    wd_k = jnp.transpose(wd_torch[:, 0], (1, 2, 0)).reshape(9, cin)   # (9, Cin)
    wp_k = jnp.transpose(wp_torch[:, :, 0, 0], (1, 0))                # (Cin, Cout)
    return (wd_k[:, :, None] * wp_k[None, :, :]).astype(jnp.float32)


def _bn_scale_shift(ssum, ssq, count, gamma, beta):
    """Training-mode BatchNorm2d affine params from accumulated sum/sumsq (f32)."""
    mean = ssum / count
    var = ssq / count - mean * mean                 # biased variance (torch train BN)
    scale = gamma.astype(jnp.float32) * jax.lax.rsqrt(var + EPS)
    shift = beta.astype(jnp.float32) - mean * scale
    return scale.reshape(1, -1), shift.reshape(1, -1)


def double_conv_forward(x_nchw, params, *, compute_dtype=jnp.float32, block_n=1):
    """Pallas implementation of double_conv(in_ch, out_ch).forward (NCHW in/out).

    compute_dtype: MXU operand dtype.  jnp.bfloat16 on v6e/v7x halves DMA
    bytes and doubles MXU rate; keep jnp.float32 on v5e or when bit-level
    agreement with an f32 reference is needed.  BN statistics and the
    normalization itself are always computed in f32.
    """
    x = jnp.transpose(x_nchw, (0, 2, 3, 1)).astype(jnp.float32)  # NCHW -> NHWC
    N, H, W, in_ch = x.shape
    count = jnp.float32(N * H * W)

    wf1 = _fold_weights(params["wd1"], params["wp1"])
    wf2 = _fold_weights(params["wd2"], params["wp2"])

    # Layer 1: conv (identity prologue) + BN1 statistics.
    ident_scale = jnp.ones((1, in_ch), jnp.float32)
    ident_shift = jnp.zeros((1, in_ch), jnp.float32)
    y1, s1, q1 = _dsconv_bn_stats(x, wf1, ident_scale, ident_shift,
                                  apply_prologue=False,
                                  compute_dtype=compute_dtype, block_n=block_n)
    sc1, sh1 = _bn_scale_shift(s1[0], q1[0], count, params["g1"], params["b1"])

    # Layer 2: BN1 + ReLU fused into the conv prologue, conv + BN2 statistics.
    y2, s2, q2 = _dsconv_bn_stats(y1, wf2, sc1, sh1,
                                  apply_prologue=True,
                                  compute_dtype=compute_dtype, block_n=block_n)
    sc2, sh2 = _bn_scale_shift(s2[0], q2[0], count, params["g2"], params["b2"])

    # Final BN2 + ReLU apply (stats already computed -> single cheap pass).
    z = _bn_relu_apply(y2, sc2, sh2, block_n=block_n)
    return jnp.transpose(z, (0, 3, 1, 2))  # NHWC -> NCHW


# --------------------------------------------------------------------------
# Pure-JAX reference (same semantics as the PyTorch module) for verification
# --------------------------------------------------------------------------
def _ref_dsconv(x_nchw, wd, wp):
    y = jax.lax.conv_general_dilated(
        x_nchw, wd, (1, 1), ((1, 1), (1, 1)),
        dimension_numbers=("NCHW", "OIHW", "NCHW"),
        feature_group_count=x_nchw.shape[1])
    y = jax.lax.conv_general_dilated(
        y, wp, (1, 1), "VALID", dimension_numbers=("NCHW", "OIHW", "NCHW"))
    return y


def _ref_bn_relu(x, gamma, beta):
    mean = x.mean(axis=(0, 2, 3), keepdims=True)
    var = ((x - mean) ** 2).mean(axis=(0, 2, 3), keepdims=True)
    y = (x - mean) * jax.lax.rsqrt(var + EPS)
    y = y * gamma.reshape(1, -1, 1, 1) + beta.reshape(1, -1, 1, 1)
    return jnp.maximum(y, 0.0)


def _ref_double_conv(x, params):
    for i in (1, 2):
        x = _ref_dsconv(x, params[f"wd{i}"], params[f"wp{i}"])
        x = _ref_bn_relu(x, params[f"g{i}"], params[f"b{i}"])
    return x


# --------------------------------------------------------------------------
if __name__ == "__main__":
    N, in_ch, out_ch, HW = 2, 4, 8, 16

    key = jax.random.PRNGKey(0)
    ks = jax.random.split(key, 9)
    params = {
        "wd1": 0.2 * jax.random.normal(ks[0], (in_ch, 1, 3, 3), jnp.float32),
        "wp1": 0.2 * jax.random.normal(ks[1], (out_ch, in_ch, 1, 1), jnp.float32),
        "g1": 1.0 + 0.1 * jax.random.normal(ks[2], (out_ch,), jnp.float32),
        "b1": 0.1 * jax.random.normal(ks[3], (out_ch,), jnp.float32),
        "wd2": 0.2 * jax.random.normal(ks[4], (out_ch, 1, 3, 3), jnp.float32),
        "wp2": 0.2 * jax.random.normal(ks[5], (out_ch, out_ch, 1, 1), jnp.float32),
        "g2": 1.0 + 0.1 * jax.random.normal(ks[6], (out_ch,), jnp.float32),
        "b2": 0.1 * jax.random.normal(ks[7], (out_ch,), jnp.float32),
    }
    x = jax.random.normal(ks[8], (N, in_ch, HW, HW), jnp.float32)

    ref = jax.block_until_ready(_ref_double_conv(x, params))

    # f32 compute path (bit-tight check against the reference).
    out = jax.block_until_ready(double_conv_forward(x, params))
    assert out.shape == (N, out_ch, HW, HW), out.shape
    assert jnp.allclose(out, ref, atol=1e-4, rtol=1e-4), \
        float(jnp.max(jnp.abs(out - ref)))

    # bf16 MXU path (v6e/v7x recommendation): stats/normalization stay f32.
    out_bf16 = jax.block_until_ready(
        double_conv_forward(x, params, compute_dtype=jnp.bfloat16))
    rel = float(jnp.linalg.norm(out_bf16 - ref) /
                (jnp.linalg.norm(ref) + 1e-12))
    assert bool(jnp.isfinite(out_bf16).all()) and rel < 1e-1, rel

    print("KERNEL_OK")
</pallas_src>

<mosaic_0001>
module attributes {stable_mosaic.version = 11 : i64} {
  func.func @_dsconv_kernel(%arg0: i32, %arg1: memref<1x16x16x4xf32, #tpu.memory_space<vmem>>, %arg2: memref<1x4xf32, #tpu.memory_space<vmem>>, %arg3: memref<1x4xf32, #tpu.memory_space<vmem>>, %arg4: memref<9x4x8xf32, #tpu.memory_space<vmem>>, %arg5: memref<1x16x16x8xf32, #tpu.memory_space<vmem>>, %arg6: memref<1x8xf32, #tpu.memory_space<vmem>>, %arg7: memref<1x8xf32, #tpu.memory_space<vmem>>, %arg8: memref<1x18x18x4xf32, #tpu.memory_space<vmem>>) attributes {dimension_semantics = [#tpu.dimension_semantics<arbitrary>], iteration_bounds = array<i64: 2>, scalar_prefetch = 0 : i64, scratch_operands = 1 : i64, tpu.core_type = #tpu.core_type<tc>, window_params = [{transform_indices = @transform_0, window_bounds = array<i64: 1, 16, 16, 4>}, {pipeline_mode = #tpu.pipeline_mode<synchronous>, transform_indices = @transform_1, window_bounds = array<i64: 1, 4>}, {pipeline_mode = #tpu.pipeline_mode<synchronous>, transform_indices = @transform_2, window_bounds = array<i64: 1, 4>}, {pipeline_mode = #tpu.pipeline_mode<synchronous>, transform_indices = @transform_3, window_bounds = array<i64: 9, 4, 8>}, {transform_indices = @transform_4, window_bounds = array<i64: 1, 16, 16, 8>}, {pipeline_mode = #tpu.pipeline_mode<synchronous>, transform_indices = @transform_5, window_bounds = array<i64: 1, 8>}, {pipeline_mode = #tpu.pipeline_mode<synchronous>, transform_indices = @transform_6, window_bounds = array<i64: 1, 8>}]} {
    %c0_i32 = arith.constant 0 : i32
    %0 = arith.cmpi eq, %arg0, %c0_i32 : i32
    %1 = arith.extui %0 : i1 to i32
    %c0_i32_0 = arith.constant 0 : i32
    %2 = arith.cmpi ne, %1, %c0_i32_0 : i32
    scf.if %2 {
      %cst_68 = arith.constant 0.000000e+00 : f32
      %74 = vector.broadcast %cst_68 : f32 to vector<1x18x18x4xf32>
      %c0_69 = arith.constant 0 : index
      %c0_70 = arith.constant 0 : index
      %c0_71 = arith.constant 0 : index
      %c0_72 = arith.constant 0 : index
      %75 = vector.load %arg8[%c0_69, %c0_70, %c0_71, %c0_72] : memref<1x18x18x4xf32, #tpu.memory_space<vmem>>, vector<1x18x18x4xf32>
      tpu.vector_store %arg8[%c0_69, %c0_70, %c0_71, %c0_72], %74 {strides = array<i32>} : memref<1x18x18x4xf32, #tpu.memory_space<vmem>>, vector<1x18x18x4xf32>,
      %cst_73 = arith.constant 0.000000e+00 : f32
      %76 = vector.broadcast %cst_73 : f32 to vector<1x8xf32>
      %c0_74 = arith.constant 0 : index
      %c0_75 = arith.constant 0 : index
      %77 = vector.load %arg6[%c0_74, %c0_75] : memref<1x8xf32, #tpu.memory_space<vmem>>, vector<1x8xf32>
      tpu.vector_store %arg6[%c0_74, %c0_75], %76 {strides = array<i32>} : memref<1x8xf32, #tpu.memory_space<vmem>>, vector<1x8xf32>,
      %cst_76 = arith.constant 0.000000e+00 : f32
      %78 = vector.broadcast %cst_76 : f32 to vector<1x8xf32>
      %c0_77 = arith.constant 0 : index
      %c0_78 = arith.constant 0 : index
      %79 = vector.load %arg7[%c0_77, %c0_78] : memref<1x8xf32, #tpu.memory_space<vmem>>, vector<1x8xf32>
      tpu.vector_store %arg7[%c0_77, %c0_78], %78 {strides = array<i32>} : memref<1x8xf32, #tpu.memory_space<vmem>>, vector<1x8xf32>,
    } else {
    }
    %c0 = arith.constant 0 : index
    %c0_1 = arith.constant 0 : index
    %c0_2 = arith.constant 0 : index
    %c0_3 = arith.constant 0 : index
    %3 = vector.load %arg1[%c0, %c0_1, %c0_2, %c0_3] : memref<1x16x16x4xf32, #tpu.memory_space<vmem>>, vector<1x16x16x4xf32>
    %c0_4 = arith.constant 0 : index
    %c1 = arith.constant 1 : index
    %c1_5 = arith.constant 1 : index
    %c0_6 = arith.constant 0 : index
    %4 = vector.load %arg8[%c0_4, %c1, %c1_5, %c0_6] : memref<1x18x18x4xf32, #tpu.memory_space<vmem>>, vector<1x16x16x4xf32>
    tpu.vector_store %arg8[%c0_4, %c1, %c1_5, %c0_6], %3 {strides = array<i32>} : memref<1x18x18x4xf32, #tpu.memory_space<vmem>>, vector<1x16x16x4xf32>,
    %c0_7 = arith.constant 0 : index
    %c0_8 = arith.constant 0 : index
    %c0_9 = arith.constant 0 : index
    %5 = vector.load %arg4[%c0_7, %c0_8, %c0_9] : memref<9x4x8xf32, #tpu.memory_space<vmem>>, vector<9x4x8xf32>
    %cst = arith.constant 0.000000e+00 : f32
    %6 = vector.broadcast %cst : f32 to vector<256x8xf32>
    %c0_10 = arith.constant 0 : index
    %c0_11 = arith.constant 0 : index
    %c0_12 = arith.constant 0 : index
    %c0_13 = arith.constant 0 : index
    %7 = vector.load %arg8[%c0_10, %c0_11, %c0_12, %c0_13] : memref<1x18x18x4xf32, #tpu.memory_space<vmem>>, vector<1x16x16x4xf32>
    %8 = vector.shape_cast %7 : vector<1x16x16x4xf32> to vector<256x4xf32>
    %9 = vector.extract_strided_slice %5 {offsets = [0, 0, 0], sizes = [1, 4, 8], strides = [1, 1, 1]} : vector<9x4x8xf32> to vector<1x4x8xf32>
    %10 = vector.shape_cast %9 : vector<1x4x8xf32> to vector<4x8xf32>
    %cst_14 = arith.constant dense<0.000000e+00> : vector<256x8xf32>
    %11 = tpu.matmul %8, %10, %cst_14 {dimension_numbers = #tpu.dot_dimension_numbers<[1], [0], [0], [1], [0, 0, 1, 1], [], []>} : vector<256x4xf32>, vector<4x8xf32>, vector<256x8xf32> -> vector<256x8xf32>
    %12 = arith.addf %6, %11 : vector<256x8xf32>
    %c0_15 = arith.constant 0 : index
    %c0_16 = arith.constant 0 : index
    %c1_17 = arith.constant 1 : index
    %c0_18 = arith.constant 0 : index
    %13 = vector.load %arg8[%c0_15, %c0_16, %c1_17, %c0_18] : memref<1x18x18x4xf32, #tpu.memory_space<vmem>>, vector<1x16x16x4xf32>
    %14 = vector.shape_cast %13 : vector<1x16x16x4xf32> to vector<256x4xf32>
    %15 = vector.extract_strided_slice %5 {offsets = [1, 0, 0], sizes = [1, 4, 8], strides = [1, 1, 1]} : vector<9x4x8xf32> to vector<1x4x8xf32>
    %16 = vector.shape_cast %15 : vector<1x4x8xf32> to vector<4x8xf32>
    %cst_19 = arith.constant dense<0.000000e+00> : vector<256x8xf32>
    %17 = tpu.matmul %14, %16, %cst_19 {dimension_numbers = #tpu.dot_dimension_numbers<[1], [0], [0], [1], [0, 0, 1, 1], [], []>} : vector<256x4xf32>, vector<4x8xf32>, vector<256x8xf32> -> vector<256x8xf32>
    %18 = arith.addf %12, %17 : vector<256x8xf32>
    %c0_20 = arith.constant 0 : index
    %c0_21 = arith.constant 0 : index
    %c2 = arith.constant 2 : index
    %c0_22 = arith.constant 0 : index
    %19 = vector.load %arg8[%c0_20, %c0_21, %c2, %c0_22] : memref<1x18x18x4xf32, #tpu.memory_space<vmem>>, vector<1x16x16x4xf32>
    %20 = vector.shape_cast %19 : vector<1x16x16x4xf32> to vector<256x4xf32>
    %21 = vector.extract_strided_slice %5 {offsets = [2, 0, 0], sizes = [1, 4, 8], strides = [1, 1, 1]} : vector<9x4x8xf32> to vector<1x4x8xf32>
    %22 = vector.shape_cast %21 : vector<1x4x8xf32> to vector<4x8xf32>
    %cst_23 = arith.constant dense<0.000000e+00> : vector<256x8xf32>
    %23 = tpu.matmul %20, %22, %cst_23 {dimension_numbers = #tpu.dot_dimension_numbers<[1], [0], [0], [1], [0, 0, 1, 1], [], []>} : vector<256x4xf32>, vector<4x8xf32>, vector<256x8xf32> -> vector<256x8xf32>
    %24 = arith.addf %18, %23 : vector<256x8xf32>
    %c0_24 = arith.constant 0 : index
    %c1_25 = arith.constant 1 : index
    %c0_26 = arith.constant 0 : index
    %c0_27 = arith.constant 0 : index
    %25 = vector.load %arg8[%c0_24, %c1_25, %c0_26, %c0_27] : memref<1x18x18x4xf32, #tpu.memory_space<vmem>>, vector<1x16x16x4xf32>
    %26 = vector.shape_cast %25 : vector<1x16x16x4xf32> to vector<256x4xf32>
    %27 = vector.extract_strided_slice %5 {offsets = [3, 0, 0], sizes = [1, 4, 8], strides = [1, 1, 1]} : vector<9x4x8xf32> to vector<1x4x8xf32>
    %28 = vector.shape_cast %27 : vector<1x4x8xf32> to vector<4x8xf32>
    %cst_28 = arith.constant dense<0.000000e+00> : vector<256x8xf32>
    %29 = tpu.matmul %26, %28, %cst_28 {dimension_numbers = #tpu.dot_dimension_numbers<[1], [0], [0], [1], [0, 0, 1, 1], [], []>} : vector<256x4xf32>, vector<4x8xf32>, vector<256x8xf32> -> vector<256x8xf32>
    %30 = arith.addf %24, %29 : vector<256x8xf32>
    %c0_29 = arith.constant 0 : index
    %c1_30 = arith.constant 1 : index
    %c1_31 = arith.constant 1 : index
    %c0_32 = arith.constant 0 : index
    %31 = vector.load %arg8[%c0_29, %c1_30, %c1_31, %c0_32] : memref<1x18x18x4xf32, #tpu.memory_space<vmem>>, vector<1x16x16x4xf32>
    %32 = vector.shape_cast %31 : vector<1x16x16x4xf32> to vector<256x4xf32>
    %33 = vector.extract_strided_slice %5 {offsets = [4, 0, 0], sizes = [1, 4, 8], strides = [1, 1, 1]} : vector<9x4x8xf32> to vector<1x4x8xf32>
    %34 = vector.shape_cast %33 : vector<1x4x8xf32> to vector<4x8xf32>
    %cst_33 = arith.constant dense<0.000000e+00> : vector<256x8xf32>
    %35 = tpu.matmul %32, %34, %cst_33 {dimension_numbers = #tpu.dot_dimension_numbers<[1], [0], [0], [1], [0, 0, 1, 1], [], []>} : vector<256x4xf32>, vector<4x8xf32>, vector<256x8xf32> -> vector<256x8xf32>
    %36 = arith.addf %30, %35 : vector<256x8xf32>
    %c0_34 = arith.constant 0 : index
    %c1_35 = arith.constant 1 : index
    %c2_36 = arith.constant 2 : index
    %c0_37 = arith.constant 0 : index
    %37 = vector.load %arg8[%c0_34, %c1_35, %c2_36, %c0_37] : memref<1x18x18x4xf32, #tpu.memory_space<vmem>>, vector<1x16x16x4xf32>
    %38 = vector.shape_cast %37 : vector<1x16x16x4xf32> to vector<256x4xf32>
    %39 = vector.extract_strided_slice %5 {offsets = [5, 0, 0], sizes = [1, 4, 8], strides = [1, 1, 1]} : vector<9x4x8xf32> to vector<1x4x8xf32>
    %40 = vector.shape_cast %39 : vector<1x4x8xf32> to vector<4x8xf32>
    %cst_38 = arith.constant dense<0.000000e+00> : vector<256x8xf32>
    %41 = tpu.matmul %38, %40, %cst_38 {dimension_numbers = #tpu.dot_dimension_numbers<[1], [0], [0], [1], [0, 0, 1, 1], [], []>} : vector<256x4xf32>, vector<4x8xf32>, vector<256x8xf32> -> vector<256x8xf32>
    %42 = arith.addf %36, %41 : vector<256x8xf32>
    %c0_39 = arith.constant 0 : index
    %c2_40 = arith.constant 2 : index
    %c0_41 = arith.constant 0 : index
    %c0_42 = arith.constant 0 : index
    %43 = vector.load %arg8[%c0_39, %c2_40, %c0_41, %c0_42] : memref<1x18x18x4xf32, #tpu.memory_space<vmem>>, vector<1x16x16x4xf32>
    %44 = vector.shape_cast %43 : vector<1x16x16x4xf32> to vector<256x4xf32>
    %45 = vector.extract_strided_slice %5 {offsets = [6, 0, 0], sizes = [1, 4, 8], strides = [1, 1, 1]} : vector<9x4x8xf32> to vector<1x4x8xf32>
    %46 = vector.shape_cast %45 : vector<1x4x8xf32> to vector<4x8xf32>
    %cst_43 = arith.constant dense<0.000000e+00> : vector<256x8xf32>
    %47 = tpu.matmul %44, %46, %cst_43 {dimension_numbers = #tpu.dot_dimension_numbers<[1], [0], [0], [1], [0, 0, 1, 1], [], []>} : vector<256x4xf32>, vector<4x8xf32>, vector<256x8xf32> -> vector<256x8xf32>
    %48 = arith.addf %42, %47 : vector<256x8xf32>
    %c0_44 = arith.constant 0 : index
    %c2_45 = arith.constant 2 : index
    %c1_46 = arith.constant 1 : index
    %c0_47 = arith.constant 0 : index
    %49 = vector.load %arg8[%c0_44, %c2_45, %c1_46, %c0_47] : memref<1x18x18x4xf32, #tpu.memory_space<vmem>>, vector<1x16x16x4xf32>
    %50 = vector.shape_cast %49 : vector<1x16x16x4xf32> to vector<256x4xf32>
    %51 = vector.extract_strided_slice %5 {offsets = [7, 0, 0], sizes = [1, 4, 8], strides = [1, 1, 1]} : vector<9x4x8xf32> to vector<1x4x8xf32>
    %52 = vector.shape_cast %51 : vector<1x4x8xf32> to vector<4x8xf32>
    %cst_48 = arith.constant dense<0.000000e+00> : vector<256x8xf32>
    %53 = tpu.matmul %50, %52, %cst_48 {dimension_numbers = #tpu.dot_dimension_numbers<[1], [0], [0], [1], [0, 0, 1, 1], [], []>} : vector<256x4xf32>, vector<4x8xf32>, vector<256x8xf32> -> vector<256x8xf32>
    %54 = arith.addf %48, %53 : vector<256x8xf32>
    %c0_49 = arith.constant 0 : index
    %c2_50 = arith.constant 2 : index
    %c2_51 = arith.constant 2 : index
    %c0_52 = arith.constant 0 : index
    %55 = vector.load %arg8[%c0_49, %c2_50, %c2_51, %c0_52] : memref<1x18x18x4xf32, #tpu.memory_space<vmem>>, vector<1x16x16x4xf32>
    %56 = vector.shape_cast %55 : vector<1x16x16x4xf32> to vector<256x4xf32>
    %57 = vector.extract_strided_slice %5 {offsets = [8, 0, 0], sizes = [1, 4, 8], strides = [1, 1, 1]} : vector<9x4x8xf32> to vector<1x4x8xf32>
    %58 = vector.shape_cast %57 : vector<1x4x8xf32> to vector<4x8xf32>
    %cst_53 = arith.constant dense<0.000000e+00> : vector<256x8xf32>
    %59 = tpu.matmul %56, %58, %cst_53 {dimension_numbers = #tpu.dot_dimension_numbers<[1], [0], [0], [1], [0, 0, 1, 1], [], []>} : vector<256x4xf32>, vector<4x8xf32>, vector<256x8xf32> -> vector<256x8xf32>
    %60 = arith.addf %54, %59 : vector<256x8xf32>
    %61 = vector.shape_cast %60 : vector<256x8xf32> to vector<1x16x16x8xf32>
    %c0_54 = arith.constant 0 : index
    %c0_55 = arith.constant 0 : index
    %c0_56 = arith.constant 0 : index
    %c0_57 = arith.constant 0 : index
    %62 = vector.load %arg5[%c0_54, %c0_55, %c0_56, %c0_57] : memref<1x16x16x8xf32, #tpu.memory_space<vmem>>, vector<1x16x16x8xf32>
    tpu.vector_store %arg5[%c0_54, %c0_55, %c0_56, %c0_57], %61 {strides = array<i32>} : memref<1x16x16x8xf32, #tpu.memory_space<vmem>>, vector<1x16x16x8xf32>,
    %c0_58 = arith.constant 0 : index
    %c0_59 = arith.constant 0 : index
    %63 = vector.load %arg6[%c0_58, %c0_59] : memref<1x8xf32, #tpu.memory_space<vmem>>, vector<1x8xf32>
    %cst_60 = arith.constant dense<0.000000e+00> : vector<8xf32>
    %64 = vector.multi_reduction <add>, %60, %cst_60 [0] : vector<256x8xf32> to vector<8xf32>
    %65 = vector.shape_cast %64 : vector<8xf32> to vector<1x8xf32>
    %66 = arith.addf %63, %65 : vector<1x8xf32>
    %c0_61 = arith.constant 0 : index
    %c0_62 = arith.constant 0 : index
    %67 = vector.load %arg6[%c0_61, %c0_62] : memref<1x8xf32, #tpu.memory_space<vmem>>, vector<1x8xf32>
    tpu.vector_store %arg6[%c0_61, %c0_62], %66 {strides = array<i32>} : memref<1x8xf32, #tpu.memory_space<vmem>>, vector<1x8xf32>,
    %c0_63 = arith.constant 0 : index
    %c0_64 = arith.constant 0 : index
    %68 = vector.load %arg7[%c0_63, %c0_64] : memref<1x8xf32, #tpu.memory_space<vmem>>, vector<1x8xf32>
    %69 = arith.mulf %60, %60 : vector<256x8xf32>
    %cst_65 = arith.constant dense<0.000000e+00> : vector<8xf32>
    %70 = vector.multi_reduction <add>, %69, %cst_65 [0] : vector<256x8xf32> to vector<8xf32>
    %71 = vector.shape_cast %70 : vector<8xf32> to vector<1x8xf32>
    %72 = arith.addf %68, %71 : vector<1x8xf32>
    %c0_66 = arith.constant 0 : index
    %c0_67 = arith.constant 0 : index
    %73 = vector.load %arg7[%c0_66, %c0_67] : memref<1x8xf32, #tpu.memory_space<vmem>>, vector<1x8xf32>
    tpu.vector_store %arg7[%c0_66, %c0_67], %72 {strides = array<i32>} : memref<1x8xf32, #tpu.memory_space<vmem>>, vector<1x8xf32>,
    return
  }
  func.func @transform_0(%arg0: i32) -> (i32, i32, i32, i32) {
    %c0_i32 = arith.constant 0 : i32
    %c0_i32_0 = arith.constant 0 : i32
    %c0_i32_1 = arith.constant 0 : i32
    %c0_i32_2 = arith.constant 0 : i32
    return %arg0, %c0_i32, %c0_i32_0, %c0_i32_1 : i32, i32, i32, i32
  }
  func.func @transform_1(%arg0: i32) -> (i32, i32) {
    %c0_i32 = arith.constant 0 : i32
    %c0_i32_0 = arith.constant 0 : i32
    %c0_i32_1 = arith.constant 0 : i32
    return %c0_i32, %c0_i32_0 : i32, i32
  }
  func.func @transform_2(%arg0: i32) -> (i32, i32) {
    %c0_i32 = arith.constant 0 : i32
    %c0_i32_0 = arith.constant 0 : i32
    %c0_i32_1 = arith.constant 0 : i32
    return %c0_i32, %c0_i32_0 : i32, i32
  }
  func.func @transform_3(%arg0: i32) -> (i32, i32, i32) {
    %c0_i32 = arith.constant 0 : i32
    %c0_i32_0 = arith.constant 0 : i32
    %c0_i32_1 = arith.constant 0 : i32
    %c0_i32_2 = arith.constant 0 : i32
    return %c0_i32, %c0_i32_0, %c0_i32_1 : i32, i32, i32
  }
  func.func @transform_4(%arg0: i32) -> (i32, i32, i32, i32) {
    %c0_i32 = arith.constant 0 : i32
    %c0_i32_0 = arith.constant 0 : i32
    %c0_i32_1 = arith.constant 0 : i32
    %c0_i32_2 = arith.constant 0 : i32
    return %arg0, %c0_i32, %c0_i32_0, %c0_i32_1 : i32, i32, i32, i32
  }
  func.func @transform_5(%arg0: i32) -> (i32, i32) {
    %c0_i32 = arith.constant 0 : i32
    %c0_i32_0 = arith.constant 0 : i32
    %c0_i32_1 = arith.constant 0 : i32
    return %c0_i32, %c0_i32_0 : i32, i32
  }
  func.func @transform_6(%arg0: i32) -> (i32, i32) {
    %c0_i32 = arith.constant 0 : i32
    %c0_i32_0 = arith.constant 0 : i32
    %c0_i32_1 = arith.constant 0 : i32
    return %c0_i32, %c0_i32_0 : i32, i32
  }
}

</mosaic_0001>

<bundles_post_ra>
// kernel: tpu_custom_call.1
= control target key start
LH: loop header
LB: loop body
LE: loop exit
PB: predicated region body
PF: predicated region fallthrough
CT: control target
= control target key end

     0   :  { %12 = vsyncpa [#allocation4], 0  ;;  %s6751_s0 = inlined_call_operand.vmem [shape: f32[2,16,16,4], index: 0, kind: input, shape index: {}]   ;;  %s6752_s1 = inlined_call_operand.vmem [shape: f32[1,4], index: 1, kind: input, shape index: {}]   ;;  %s6753_s2 = inlined_call_operand.vmem [shape: f32[1,4], index: 2, kind: input, shape index: {}]   ;;  %s6754_s3 = inlined_call_operand.vmem [shape: f32[9,4,8], index: 3, kind: input, shape index: {}]   ;;  %s6755_s4 = inlined_call_operand.vmem [shape: f32[2,16,16,8], index: 4, kind: output, shape index: {0}]   ;;  %s6756_s5 = inlined_call_operand.hbm [shape: f32[1,8], index: 5, kind: output, shape index: {1}]   ;;  %s6757_s6 = inlined_call_operand.hbm [shape: f32[1,8], index: 6, kind: output, shape index: {2}]  }
   0x1   :  { %13 = vsyncpa [#allocation6], 0  ;;  %s5577_s21 = smov 0  }
   0x2 LB: > { %s5583_s1 = sadd.s32 4294967295, %s5537_s21   ;;  %p4132_p0 = scmp.ge.s32.totalorder %s5537_s21, 1  ;;  %s5537_s21 = sphi %s5577_s21, %s19_s21  }
   0x3   : > { %p209_p1 = scmp.lt.s32.totalorder %s5537_s21, 3 }
   0x5   : > { %p210_p2 = pnand %p4132_p0, %p209_p1 }
   0x7   : > { %213 = sbr.rel (%p210_p2) target bundleno = 615 (0x267), region = 36 }
   0xe   : > { %p239_p3 = scmp.lt.s32.totalorder %s5583_s1, 1  ;;  %p4137_p4 = scmp.ne.s32.totalorder %s5583_s1, 0 }
   0xf   : > { %vm253_vm0 = vcmask (!%p4137_p4), 31744   ;;  %vm256_vm1 = vcmask (!%p4137_p4), 25600   ;;  %vm309_vm2 = vcmask (!%p4137_p4), 57344   ;;  %v5539_v0 = vmov (!%p4137_p4), 0.0  }
  0x10   : > { %s240_s2 = scalar_select %p239_p3, %s5583_s1, 1 }
  0x11   : > { %252 = sbr.rel (%p4137_p4) target bundleno = 45 (0x2d), region = 40  ;;  %254 = vst.msk [vmem:[#allocation2] sm:$0xff] (!%p4137_p4), %vm253_vm0, %v5539_v0  ;;  %255 = vst.msk [vmem:[#allocation2 + $0x8] sm:$0xff] (!%p4137_p4), %vm253_vm0, %v5539_v0 }
  0x12   : > { %s4441_s22 = sshll.u32 %s240_s2, 8  ;;  %258 = vst.msk [vmem:[#allocation2 + $0x18] sm:$0xff] (!%p4137_p4), %vm253_vm0, %v5539_v0  ;;  %259 = vst.msk [vmem:[#allocation2 + $0x20] sm:$0xff] (!%p4137_p4), %vm253_vm0, %v5539_v0 }
  0x13   : > { %s5592_s25 = scalar_lea.vmem %s6751_s0, %s4441_s22  ;;  %s5597_s28 = scalar_lea.vmem %s6755_s4, %s4441_s22  ;;  %261 = vst.msk [vmem:[#allocation2 + $0x30] sm:$0xff] (!%p4137_p4), %vm253_vm0, %v5539_v0  ;;  %262 = vst.msk [vmem:[#allocation2 + $0x38] sm:$0xff] (!%p4137_p4), %vm253_vm0, %v5539_v0 }
  0x14   : > { %264 = vst.msk [vmem:[#allocation2 + $0x48] sm:$0xff] (!%p4137_p4), %vm253_vm0, %v5539_v0  ;;  %265 = vst.msk [vmem:[#allocation2 + $0x50] sm:$0xff] (!%p4137_p4), %vm253_vm0, %v5539_v0 }
  0x15   : > { %267 = vst.msk [vmem:[#allocation2 + $0x60] sm:$0xff] (!%p4137_p4), %vm253_vm0, %v5539_v0  ;;  %268 = vst.msk [vmem:[#allocation2 + $0x68] sm:$0xff] (!%p4137_p4), %vm253_vm0, %v5539_v0 }
  0x16   : > { %270 = vst.msk [vmem:[#allocation2 + $0x78] sm:$0xff] (!%p4137_p4), %vm253_vm0, %v5539_v0  ;;  %271 = vst.msk [vmem:[#allocation2 + $0x80] sm:$0xff] (!%p4137_p4), %vm253_vm0, %v5539_v0 }
  0x17   : > { %273 = vst.msk [vmem:[#allocation2 + $0x90] sm:$0xff] (!%p4137_p4), %vm253_vm0, %v5539_v0  ;;  %274 = vst.msk [vmem:[#allocation2 + $0x98] sm:$0xff] (!%p4137_p4), %vm253_vm0, %v5539_v0 }
  0x18   : > { %276 = vst.msk [vmem:[#allocation2 + $0xa8] sm:$0xff] %vm253_vm0, %v5539_v0  ;;  %277 = vst.msk [vmem:[#allocation2 + $0xb0] sm:$0xff] %vm253_vm0, %v5539_v0 }
  0x19   : > { %279 = vst.msk [vmem:[#allocation2 + $0xc0] sm:$0xff] %vm253_vm0, %v5539_v0  ;;  %280 = vst.msk [vmem:[#allocation2 + $0xc8] sm:$0xff] %vm253_vm0, %v5539_v0 }
  0x1a   : > { %282 = vst.msk [vmem:[#allocation2 + $0xd8] sm:$0xff] %vm253_vm0, %v5539_v0  ;;  %283 = vst.msk [vmem:[#allocation2 + $0xe0] sm:$0xff] %vm253_vm0, %v5539_v0 }
  0x1b   : > { %285 = vst.msk [vmem:[#allocation2 + $0xf0] sm:$0xff] %vm253_vm0, %v5539_v0  ;;  %286 = vst.msk [vmem:[#allocation2 + $0xf8] sm:$0xff] %vm253_vm0, %v5539_v0 }
  0x1c   : > { %288 = vst.msk [vmem:[#allocation2 + $0x108] sm:$0xff] %vm253_vm0, %v5539_v0  ;;  %289 = vst.msk [vmem:[#allocation2 + $0x110] sm:$0xff] %vm253_vm0, %v5539_v0 }
  0x1d   : > { %291 = vst.msk [vmem:[#allocation2 + $0x120] sm:$0xff] %vm253_vm0, %v5539_v0  ;;  %292 = vst.msk [vmem:[#allocation2 + $0x128] sm:$0xff] %vm253_vm0, %v5539_v0 }
  0x1e   : > { %294 = vst.msk [vmem:[#allocation2 + $0x138] sm:$0xff] %vm253_vm0, %v5539_v0  ;;  %295 = vst.msk [vmem:[#allocation2 + $0x140] sm:$0xff] %vm253_vm0, %v5539_v0 }
  0x1f   : > { %297 = vst.msk [vmem:[#allocation2 + $0x150] sm:$0xff] %vm253_vm0, %v5539_v0  ;;  %298 = vst.msk [vmem:[#allocation2 + $0x158] sm:$0xff] %vm253_vm0, %v5539_v0 }
  0x20   : > { %300 = vst.msk [vmem:[#allocation2 + $0x168] sm:$0xff] %vm253_vm0, %v5539_v0  ;;  %301 = vst.msk [vmem:[#allocation2 + $0x170] sm:$0xff] %vm253_vm0, %v5539_v0 }
  0x21   : > { %303 = vst.msk [vmem:[#allocation2 + $0x180] sm:$0xff] %vm253_vm0, %v5539_v0  ;;  %304 = vst.msk [vmem:[#allocation2 + $0x188] sm:$0xff] %vm253_vm0, %v5539_v0 }
  0x22   : > { %306 = vst.msk [vmem:[#allocation2 + $0x198] sm:$0xff] %vm253_vm0, %v5539_v0  ;;  %307 = vst.msk [vmem:[#allocation2 + $0x1a0] sm:$0xff] %vm253_vm0, %v5539_v0 }
  0x23   : > { %257 = vst.msk [vmem:[#allocation2 + $0x10] sm:$0x3] %vm256_vm1, %v5539_v0  ;;  %260 = vst.msk [vmem:[#allocation2 + $0x28] sm:$0x3] %vm256_vm1, %v5539_v0 }
  0x24   : > { %263 = vst.msk [vmem:[#allocation2 + $0x40] sm:$0x3] %vm256_vm1, %v5539_v0  ;;  %266 = vst.msk [vmem:[#allocation2 + $0x58] sm:$0x3] %vm256_vm1, %v5539_v0 }
  0x25   : > { %269 = vst.msk [vmem:[#allocation2 + $0x70] sm:$0x3] %vm256_vm1, %v5539_v0  ;;  %272 = vst.msk [vmem:[#allocation2 + $0x88] sm:$0x3] %vm256_vm1, %v5539_v0 }
  0x26   : > { %275 = vst.msk [vmem:[#allocation2 + $0xa0] sm:$0x3] %vm256_vm1, %v5539_v0  ;;  %278 = vst.msk [vmem:[#allocation2 + $0xb8] sm:$0x3] %vm256_vm1, %v5539_v0 }
  0x27   : > { %281 = vst.msk [vmem:[#allocation2 + $0xd0] sm:$0x3] %vm256_vm1, %v5539_v0  ;;  %284 = vst.msk [vmem:[#allocation2 + $0xe8] sm:$0x3] %vm256_vm1, %v5539_v0 }
  0x28   : > { %287 = vst.msk [vmem:[#allocation2 + $0x100] sm:$0x3] %vm256_vm1, %v5539_v0  ;;  %290 = vst.msk [vmem:[#allocation2 + $0x118] sm:$0x3] %vm256_vm1, %v5539_v0 }
  0x29   : > { %293 = vst.msk [vmem:[#allocation2 + $0x130] sm:$0x3] %vm256_vm1, %v5539_v0  ;;  %296 = vst.msk [vmem:[#allocation2 + $0x148] sm:$0x3] %vm256_vm1, %v5539_v0 }
  0x2a   : > { %299 = vst.msk [vmem:[#allocation2 + $0x160] sm:$0x3] %vm256_vm1, %v5539_v0  ;;  %302 = vst.msk [vmem:[#allocation2 + $0x178] sm:$0x3] %vm256_vm1, %v5539_v0 }
  0x2b   : > { %305 = vst.msk [vmem:[#allocation2 + $0x190] sm:$0x3] %vm256_vm1, %v5539_v0  ;;  %308 = vst.msk [vmem:[#allocation2 + $0x1a8] sm:$0x3] %vm256_vm1, %v5539_v0 }
  0x2c   : > { %310 = vst.msk [vmem:[#allocation3] sm:$0x1] %vm309_vm2, %v5539_v0  ;;  %311 = vst.msk [vmem:[#allocation5] sm:$0x1] %vm309_vm2, %v5539_v0 }
  0x2d PF: > { %v379_v1 = vld [vmem:[%s6754_s3 + $0x4] sm:$0xf]  ;;  %vm547_vm3 = vcmask 1043456   ;;  %vm345_vm4 = vcmask 31744   ;;  %v420_v3 = vld [vmem:[#allocation2 + $0x9] sm:$0xff]  ;;  %v315_v10 = vld [vmem:[%s5592_s25 + $0x18] sm:$0xff] }
  0x2e   : > { %v419_v2 = vld [vmem:[#allocation2 + $0x1] sm:$0xff]  ;;  %4740 = vmatprep.subr.msk.mxu1 %vm547_vm3, %v379_v1  ;;  %v5664_v4 = vld [vmem:[%s6754_s3 + $0x10] sm:$0xf]  ;;  %v383_v7 = vld [vmem:[%s6754_s3 + $0x14] sm:$0xf]  ;;  %349 = vst.msk [vmem:[#allocation2 + $0x39] sm:$0xff] %vm345_vm4, %v315_v10 }
  0x2f   : > { %4742 = vmatprep.mubr.msk.f32.mxu1 %vm345_vm4, %v419_v2  ;;  %v312_v5 = vld [vmem:[%s5592_s25] sm:$0xff]  ;;  %4741 = vmatpush3.msk.msra.mxu1 %vm547_vm3, %v379_v1  ;;  %v313_v8 = vld [vmem:[%s5592_s25 + $0x8] sm:$0xff]  ;;  %v314_v9 = vld [vmem:[%s5592_s25 + $0x10] sm:$0xff]  ;;  %vm3817_vm5 = vcmask 64512   ;;  %s5540_s23 = smov [#allocation3]   ;;  %vm3921_vm6 = vcmask 57344  }
  0x30   : > { %v378_v6 = vld [vmem:[%s6754_s3] sm:$0xf]  ;;  %4940 = vmatprep.subr.msk.mxu0 %vm547_vm3, %v5664_v4  ;;  %346 = vst.msk [vmem:[#allocation2 + $0x19] sm:$0xff] %vm345_vm4, %v312_v5  ;;  %4743 = vmatmul.mubr.msk.f32.vlgmr.msra.gmra.mrb[0].mxu1 %vm345_vm4, %v420_v3  ;;  %347 = vst.msk [vmem:[#allocation2 + $0x21] sm:$0xff] %vm345_vm4, %v313_v8  ;;  %v317_v12 = vld [vmem:[%s5592_s25 + $0x28] sm:$0xff]  ;;  %s4042_s24 = sshll.u32 %s5540_s23, 4  ;;  %s4043_s24 = int_to_ptr.vmem [resolvable:$true] %s4042_s24 }
  0x31   : > { %4941 = vmatpush3.msk.msra.mxu0 %vm547_vm3, %v5664_v4  ;;  %348 = vst.msk [vmem:[#allocation2 + $0x31] sm:$0xff] %vm345_vm4, %v314_v9  ;;  %v316_v11 = vld [vmem:[%s5592_s25 + $0x20] sm:$0xff]  ;;  %4790 = vmatprep.subr.msk.mxu1 %vm547_vm3, %v378_v6  ;;  %351 = vst.msk [vmem:[#allocation2 + $0x51] sm:$0xff] %vm345_vm4, %v317_v12  ;;  %v318_v13 = vld [vmem:[%s5592_s25 + $0x30] sm:$0xff]  ;;  %p5456_p5 = scmp.eq.s32.totalorder %s5583_s1, 1  ;;  %s5471_s27 = scalar_lea.vmem %s4043_s24, 16 }
  0x32   : > { %4990 = vmatprep.subr.msk.mxu0 %vm547_vm3, %v383_v7  ;;  %350 = vst.msk [vmem:[#allocation2 + $0x49] sm:$0xff] %vm345_vm4, %v316_v11  ;;  %v319_v14 = vld [vmem:[%s5592_s25 + $0x38] sm:$0xff]  ;;  %v320_v15 = vld [vmem:[%s5592_s25 + $0x40] sm:$0xff]  ;;  %4791 = vmatpush3.msk.msra.mxu1 %vm547_vm3, %v378_v6  ;;  %352 = vst.msk [vmem:[#allocation2 + $0x61] sm:$0xff] %vm345_vm4, %v318_v13  ;;  %p5472_p6 = scmp.ne.s32.totalorder %s4043_s24, %s5471_s27  ;;  %p5478_p9 = scmp.lt.s32.totalorder %s4043_s24, %s4043_s24 }
  0x33   : > { %353 = vst.msk [vmem:[#allocation2 + $0x69] sm:$0xff] %vm345_vm4, %v319_v14  ;;  %354 = vst.msk [vmem:[#allocation2 + $0x79] sm:$0xff] %vm345_vm4, %v320_v15  ;;  %v321_v16 = vld [vmem:[%s5592_s25 + $0x48] sm:$0xff]  ;;  %v322_v17 = vld [vmem:[%s5592_s25 + $0x50] sm:$0xff] }
  0x34   : > { %v323_v18 = vld [vmem:[%s5592_s25 + $0x58] sm:$0xff]  ;;  %355 = vst.msk [vmem:[#allocation2 + $0x81] sm:$0xff] %vm345_vm4, %v321_v16  ;;  %356 = vst.msk [vmem:[#allocation2 + $0x91] sm:$0xff] %vm345_vm4, %v322_v17  ;;  %v324_v19 = vld [vmem:[%s5592_s25 + $0x60] sm:$0xff]  ;;  %p5473_p7 = pnand %p5472_p6, %p5456_p5 }
  0x35   : > { %357 = vst.msk [vmem:[#allocation2 + $0x99] sm:$0xff] %vm345_vm4, %v323_v18  ;;  %v325_v20 = vld [vmem:[%s5592_s25 + $0x68] sm:$0xff]  ;;  %v326_v21 = vld [vmem:[%s5592_s25 + $0x70] sm:$0xff]  ;;  %358 = vst.msk [vmem:[#allocation2 + $0xa9] sm:$0xff] %vm345_vm4, %v324_v19 }
  0x36   : > { %359 = vst.msk [vmem:[#allocation2 + $0xb1] sm:$0xff] %vm345_vm4, %v325_v20  ;;  %360 = vst.msk [vmem:[#allocation2 + $0xc1] sm:$0xff] %vm345_vm4, %v326_v21  ;;  %v327_v22 = vld [vmem:[%s5592_s25 + $0x78] sm:$0xff]  ;;  %v328_v23 = vld [vmem:[%s5592_s25 + $0x80] sm:$0xff]  ;;  %p5474_p8 = pneg %p5473_p7 }
  0x37   : > { %361 = vst.msk [vmem:[#allocation2 + $0xc9] sm:$0xff] %vm345_vm4, %v327_v22  ;;  %362 = vst.msk [vmem:[#allocation2 + $0xd9] sm:$0xff] %vm345_vm4, %v328_v23  ;;  %v329_v24 = vld [vmem:[%s5592_s25 + $0x88] sm:$0xff]  ;;  %v330_v25 = vld [vmem:[%s5592_s25 + $0x90] sm:$0xff] }
  0x38   : > { %v331_v26 = vld [vmem:[%s5592_s25 + $0x98] sm:$0xff]  ;;  %363 = vst.msk [vmem:[#allocation2 + $0xe1] sm:$0xff] %vm345_vm4, %v329_v24  ;;  %364 = vst.msk [vmem:[#allocation2 + $0xf1] sm:$0xff] %vm345_vm4, %v330_v25  ;;  %v332_v28 = vld [vmem:[%s5592_s25 + $0xa0] sm:$0xff] }
  0x39   : > { %v421_v27 = vld [vmem:[#allocation2 + $0x19] sm:$0xff]  ;;  %365 = vst.msk [vmem:[#allocation2 + $0xf9] sm:$0xff] %vm345_vm4, %v331_v26  ;;  %v333_v29 = vld [vmem:[%s5592_s25 + $0xa8] sm:$0xff]  ;;  %v5725_v31 = vld [vmem:[#allocation2 + $0x31] sm:$0xff] }
  0x3a   : > { %4745 = vmatprep.mubr.msk.f32.mxu1 %vm345_vm4, %v421_v27  ;;  %4942 = vmatprep.mubr.msk.f32.mxu0 %vm345_vm4, %v421_v27  ;;  %v422_v30 = vld [vmem:[#allocation2 + $0x21] sm:$0xff]  ;;  %v5730_v32 = vld [vmem:[%s6754_s3 + $0x18] sm:$0xf]  ;;  %366 = vst.msk [vmem:[#allocation2 + $0x109] sm:$0xff] %vm345_vm4, %v332_v28  ;;  %367 = vst.msk [vmem:[#allocation2 + $0x111] sm:$0xff] %vm345_vm4, %v333_v29 }
  0x3b   : > { %4746 = vmatmul.mubr.msk.f32.gmra.mrb[2].mxu1 %vm345_vm4, %v422_v30  ;;  %4943 = vmatmul.mubr.msk.f32.vlgmr.msra.gmra.mrb[0].mxu0 %vm345_vm4, %v422_v30  ;;  %v5739_v33 = vld [vmem:[#allocation2 + $0x39] sm:$0xff]  ;;  %v5743_v34 = vld [vmem:[#allocation2 + $0x49] sm:$0xff]  ;;  %v5755_v35 = vld [vmem:[#allocation2 + $0x51] sm:$0xff] }
  0x3c   : > { %4991 = vmatpush3.msk.msra.mxu0 %vm547_vm3, %v383_v7  ;;  %4748 = vmatprep.mubr.msk.f32.mxu1 %vm345_vm4, %v5725_v31  ;;  %v5757_v36 = vld [vmem:[#allocation2 + $0x61] sm:$0xff]  ;;  %v334_v37 = vld [vmem:[%s5592_s25 + $0xb0] sm:$0xff]  ;;  %v335_v38 = vld [vmem:[%s5592_s25 + $0xb8] sm:$0xff] }
  0x3d   : > { %4945 = vmatprep.mubr.msk.f32.mxu0 %vm345_vm4, %v5725_v31  ;;  %5040 = vmatprep.subr.msk.mxu0 %vm547_vm3, %v5730_v32  ;;  %v5769_v39 = vld [vmem:[#allocation2 + $0x69] sm:$0xff]  ;;  %368 = vst.msk [vmem:[#allocation2 + $0x121] sm:$0xff] %vm345_vm4, %v334_v37  ;;  %369 = vst.msk [vmem:[#allocation2 + $0x129] sm:$0xff] %vm345_vm4, %v335_v38  ;;  %v336_v40 = vld [vmem:[%s5592_s25 + $0xc0] sm:$0xff] }
  0x3e   : > { %v5774_v41 = vld [vmem:[#allocation2 + $0x79] sm:$0xff]  ;;  %370 = vst.msk [vmem:[#allocation2 + $0x139] sm:$0xff] %vm345_vm4, %v336_v40  ;;  %v337_v42 = vld [vmem:[%s5592_s25 + $0xc8] sm:$0xff]  ;;  %v338_v43 = vld [vmem:[%s5592_s25 + $0xd0] sm:$0xff] }
  0x3f   : > { %4749 = vmatmul.mubr.msk.f32.gmra.mrb[4].mxu1 %vm345_vm4, %v5739_v33  ;;  %4946 = vmatmul.mubr.msk.f32.gmra.mrb[2].mxu0 %vm345_vm4, %v5739_v33  ;;  %371 = vst.msk [vmem:[#allocation2 + $0x141] sm:$0xff] %vm345_vm4, %v337_v42  ;;  %372 = vst.msk [vmem:[#allocation2 + $0x151] sm:$0xff] %vm345_vm4, %v338_v43  ;;  %v339_v44 = vld [vmem:[%s5592_s25 + $0xd8] sm:$0xff]  ;;  %v340_v45 = vld [vmem:[%s5592_s25 + $0xe0] sm:$0xff] }
  0x40   : > { %4751 = vmatprep.mubr.msk.f32.mxu1 %vm345_vm4, %v5743_v34  ;;  %4948 = vmatprep.mubr.msk.f32.mxu0 %vm345_vm4, %v5743_v34  ;;  %373 = vst.msk [vmem:[#allocation2 + $0x159] sm:$0xff] %vm345_vm4, %v339_v44  ;;  %v341_v46 = vld [vmem:[%s5592_s25 + $0xe8] sm:$0xff]  ;;  %374 = vst.msk [vmem:[#allocation2 + $0x169] sm:$0xff] %vm345_vm4, %v340_v45  ;;  %v5797_v48 = vld [vmem:[#allocation2 + $0x91] sm:$0xff] }
  0x41   : > { %v5793_v47 = vld [vmem:[#allocation2 + $0x81] sm:$0xff]  ;;  %375 = vst.msk [vmem:[#allocation2 + $0x171] sm:$0xff] %vm345_vm4, %v341_v46  ;;  %v5812_v50 = vld [vmem:[#allocation2 + $0x99] sm:$0xff]  ;;  %v5814_v51 = vld [vmem:[#allocation2 + $0xa9] sm:$0xff] }
  0x42   : > { %v5802_v49 = vld [vmem:[%s6754_s3 + $0x8] sm:$0xf]  ;;  %v5826_v52 = vld [vmem:[#allocation2 + $0xb1] sm:$0xff]  ;;  %v5840_v55 = vld [vmem:[#allocation2 + $0xd9] sm:$0xff] }
  0x43   : > { %4752 = vmatmul.mubr.msk.f32.gmra.mrb[6].mxu1 %vm345_vm4, %v5755_v35  ;;  %4949 = vmatmul.mubr.msk.f32.gmra.mrb[4].mxu0 %vm345_vm4, %v5755_v35  ;;  %v5828_v53 = vld [vmem:[#allocation2 + $0xc1] sm:$0xff]  ;;  %v5838_v54 = vld [vmem:[#allocation2 + $0xc9] sm:$0xff]  ;;  %6805 = vst [vmem:[#allocation10_spill] sm:$0xff] %v5840_v55  ;;  %v343_v58 = vld [vmem:[%s5592_s25 + $0xf8] sm:$0xff] }
  0x44   : > { %4754 = vmatprep.mubr.msk.f32.mxu1 %vm345_vm4, %v5757_v36  ;;  %4951 = vmatprep.mubr.msk.f32.mxu0 %vm345_vm4, %v5757_v36  ;;  %6804 = vst [vmem:[#allocation9_spill] sm:$0xff] %v5838_v54  ;;  %v5842_v56 = vld [vmem:[#allocation2 + $0x1a] sm:$0xff]  ;;  %v342_v57 = vld [vmem:[%s5592_s25 + $0xf0] sm:$0xff]  ;;  %377 = vst.msk [vmem:[#allocation2 + $0x189] sm:$0xff] %vm345_vm4, %v343_v58  ;;  %s5541_s25 = smov [#allocation5]  }
  0x45   : > { %4840 = vmatprep.subr.msk.mxu1 %vm547_vm3, %v5802_v49  ;;  %376 = vst.msk [vmem:[#allocation2 + $0x181] sm:$0xff] %vm345_vm4, %v342_v57  ;;  %v5856_v59 = vld [vmem:[#allocation2 + $0xe1] sm:$0xff]  ;;  %v5860_v61 = vld [vmem:[#allocation2 + $0xf1] sm:$0xff]  ;;  %v5867_v63 = vld [vmem:[%s6754_s3 + $0x1c] sm:$0xf]  ;;  %s4053_s26 = sshll.u32 %s5541_s25, 4  ;;  %s6695_s26 = int_to_ptr.vmem [resolvable:$true] %s4053_s26 }
  0x46   : > { %6806 = vst [vmem:[#allocation11_spill] sm:$0xff] %v5856_v59  ;;  %v5858_v60 = vld [vmem:[#allocation2 + $0x22] sm:$0xff]  ;;  %6807 = vst [vmem:[#allocation12_spill] sm:$0xff] %v5860_v61  ;;  %v5862_v62 = vld [vmem:[#allocation2 + $0x32] sm:$0xff] }
  0x47   : > { %4755 = vmatmul.mubr.msk.f32.gmra.mrb[8].mxu1 %vm345_vm4, %v5769_v39  ;;  %4952 = vmatmul.mubr.msk.f32.gmra.mrb[6].mxu0 %vm345_vm4, %v5769_v39  ;;  %v5877_v0 = vld [vmem:[#allocation2 + $0xf9] sm:$0xff]  ;;  %v5883_v2 = vld [vmem:[#allocation2 + $0x109] sm:$0xff]  ;;  %v5897_v5 = vld [vmem:[#allocation2 + $0x111] sm:$0xff] }
  0x48   : > { %4757 = vmatprep.mubr.msk.f32.mxu1 %vm345_vm4, %v5774_v41  ;;  %4954 = vmatprep.mubr.msk.f32.mxu0 %vm345_vm4, %v5774_v41  ;;  %6808 = vst [vmem:[#allocation13_spill] sm:$0xff] %v5877_v0  ;;  %v5879_v1 = vld [vmem:[#allocation2 + $0x3a] sm:$0xff]  ;;  %6809 = vst [vmem:[#allocation14_spill] sm:$0xff] %v5883_v2  ;;  %v5885_v3 = vld [vmem:[#allocation2 + $0x4a] sm:$0xff] }
  0x49   : > { %6810 = vst [vmem:[#allocation15_spill] sm:$0xff] %v5897_v5  ;;  %v5899_v6 = vld [vmem:[#allocation2 + $0x52] sm:$0xff]  ;;  %v5901_v7 = vld [vmem:[#allocation2 + $0x121] sm:$0xff]  ;;  %v5913_v9 = vld [vmem:[#allocation2 + $0x129] sm:$0xff] }
  0x4a   : > { %6811 = vst [vmem:[#allocation16_spill] sm:$0xff] %v5901_v7  ;;  %v5903_v8 = vld [vmem:[#allocation2 + $0x62] sm:$0xff]  ;;  %6812 = vst [vmem:[#allocation17_spill] sm:$0xff] %v5913_v9  ;;  %v5915_v10 = vld [vmem:[#allocation2 + $0x6a] sm:$0xff] }
  0x4b   : > { %4758 = vmatmul.mubr.msk.f32.gmra.mrb[10].mxu1 %vm345_vm4, %v5793_v47  ;;  %4955 = vmatmul.mubr.msk.f32.gmra.mrb[8].mxu0 %vm345_vm4, %v5793_v47  ;;  %v5917_v11 = vld [vmem:[#allocation2 + $0x139] sm:$0xff]  ;;  %v5929_v13 = vld [vmem:[#allocation2 + $0x141] sm:$0xff]  ;;  %v5933_v15 = vld [vmem:[#allocation2 + $0x151] sm:$0xff] }
  0x4c   : > { %4760 = vmatprep.mubr.msk.f32.mxu1 %vm345_vm4, %v5797_v48  ;;  %4957 = vmatprep.mubr.msk.f32.mxu0 %vm345_vm4, %v5797_v48  ;;  %6813 = vst [vmem:[#allocation18_spill] sm:$0xff] %v5917_v11  ;;  %v5919_v12 = vld [vmem:[#allocation2 + $0x7a] sm:$0xff]  ;;  %6814 = vst [vmem:[#allocation19_spill] sm:$0xff] %v5929_v13  ;;  %v5931_v14 = vld [vmem:[#allocation2 + $0x82] sm:$0xff] }
  0x4d   : > { %6815 = vst [vmem:[#allocation20_spill] sm:$0xff] %v5933_v15  ;;  %v5935_v16 = vld [vmem:[#allocation2 + $0x92] sm:$0xff]  ;;  %v5947_v18 = vld [vmem:[#allocation2 + $0x9a] sm:$0xff]  ;;  %v5949_v19 = vld [vmem:[#allocation2 + $0x169] sm:$0xff] }
  0x4e   : > { %v5945_v17 = vld [vmem:[#allocation2 + $0x159] sm:$0xff]  ;;  %6817 = vst [vmem:[#allocation22_spill] sm:$0xff] %v5949_v19  ;;  %v5951_v20 = vld [vmem:[#allocation2 + $0xaa] sm:$0xff]  ;;  %v5965_v24 = vld [vmem:[#allocation2 + $0xc2] sm:$0xff] }
  0x4f   : > { %4761 = vmatmul.mubr.msk.f32.gmra.mrb[12].mxu1 %vm345_vm4, %v5812_v50  ;;  %4958 = vmatmul.mubr.msk.f32.gmra.mrb[10].mxu0 %vm345_vm4, %v5812_v50  ;;  %6816 = vst [vmem:[#allocation21_spill] sm:$0xff] %v5945_v17  ;;  %v5961_v21 = vld [vmem:[#allocation2 + $0x171] sm:$0xff]  ;;  %v387_v23 = vld [vmem:[#allocation2] sm:$0xff]  ;;  %v388_v25 = vld [vmem:[#allocation2 + $0x8] sm:$0xff] }
  0x50   : > { %4763 = vmatprep.mubr.msk.f32.mxu1 %vm345_vm4, %v5814_v51  ;;  %4960 = vmatprep.mubr.msk.f32.mxu0 %vm345_vm4, %v5814_v51  ;;  %6818 = vst [vmem:[#allocation23_spill] sm:$0xff] %v5961_v21  ;;  %v5963_v22 = vld [vmem:[#allocation2 + $0xb2] sm:$0xff]  ;;  %v5974_v26 = vld [vmem:[#allocation2 + $0xca] sm:$0xff]  ;;  %v5978_v28 = vld [vmem:[#allocation2 + $0xda] sm:$0xff] }
  0x51   : > { %v5976_v27 = vld [vmem:[#allocation2 + $0x18] sm:$0xff]  ;;  %v5986_v29 = vld [vmem:[%s6754_s3 + $0xc] sm:$0xf]  ;;  %v5992_v30 = vld [vmem:[#allocation2 + $0x20] sm:$0xff] }
  0x52   : > { %6819 = vst [vmem:[#allocation24_spill] sm:$0xff] %v5976_v27  ;;  %6820 = vst [vmem:[#allocation25_spill] sm:$0xff] %v5992_v30  ;;  %v5998_v37 = vld [vmem:[#allocation2 + $0x30] sm:$0xff]  ;;  %v6012_v40 = vld [vmem:[#allocation2 + $0x38] sm:$0xff] }
  0x53   : > { %4764 = vmatmul.mubr.msk.f32.gmra.mrb[14].mxu1 %vm345_vm4, %v5826_v52  ;;  %4961 = vmatmul.mubr.msk.f32.gmra.mrb[12].mxu0 %vm345_vm4, %v5826_v52  ;;  %6821 = vst [vmem:[#allocation26_spill] sm:$0xff] %v5998_v37  ;;  %v6000_v38 = vld [vmem:[#allocation2 + $0xf2] sm:$0xff]  ;;  %6822 = vst [vmem:[#allocation27_spill] sm:$0xff] %v6012_v40  ;;  %v6014_v42 = vld [vmem:[#allocation2 + $0xfa] sm:$0xff] }
  0x54   : > { %4766 = vmatprep.mubr.msk.f32.mxu1 %vm345_vm4, %v5828_v53  ;;  %4963 = vmatprep.mubr.msk.f32.mxu0 %vm345_vm4, %v5828_v53  ;;  %v6016_v43 = vld [vmem:[#allocation2 + $0x48] sm:$0xff]  ;;  %v6028_v45 = vld [vmem:[#allocation2 + $0x50] sm:$0xff] }
  0x55   : > { %6823 = vst [vmem:[#allocation28_spill] sm:$0xff] %v6016_v43  ;;  %v6018_v44 = vld [vmem:[#allocation2 + $0x10a] sm:$0xff]  ;;  %6824 = vst [vmem:[#allocation29_spill] sm:$0xff] %v6028_v45  ;;  %v6030_v46 = vld [vmem:[#allocation2 + $0x112] sm:$0xff] }
  0x56   : > { %v6034_v57 = vld [vmem:[#allocation2 + $0x122] sm:$0xff] }
  0x57   : > { %4767 = vmatmul.mubr.msk.f32.gmra.mrb[16].mxu1 %vm345_vm4, %v5838_v54  ;;  %4964 = vmatmul.mubr.msk.f32.gmra.mrb[14].mxu0 %vm345_vm4, %v5838_v54  ;;  %v6044_v58 = vld [vmem:[#allocation2 + $0x68] sm:$0xff]  ;;  %v6122_v54 = vld [vmem:[#allocation2 + $0xe0] sm:$0xff] }
  0x58   : > { %4769 = vmatprep.mubr.msk.f32.mxu1 %vm345_vm4, %v5840_v55  ;;  %4992 = vmatprep.mubr.msk.f32.mxu0 %vm345_vm4, %v5842_v56  ;;  %6826 = vst [vmem:[#allocation31_spill] sm:$0xff] %v6044_v58  ;;  %v6110_v55 = vld [vmem:[#allocation2 + $0x18a] sm:$0xff] }
  0x59   : > { %6834 = vst [vmem:[#allocation39_spill] sm:$0xff] %v6110_v55 }
  0x5b   : > { %4770 = vmatmul.mubr.msk.f32.gmra.mrb[18].mxu1 %vm345_vm4, %v5856_v59  ;;  %4993 = vmatmul.mubr.msk.f32.vlgmr.msra.gmra.mrb[0].mxu0 %vm345_vm4, %v5858_v60  ;;  %v6098_v59 = vld [vmem:[#allocation2 + $0x182] sm:$0xff] }
  0x5c   : > { %5041 = vmatpush3.msk.msra.mxu0 %vm547_vm3, %v5730_v32  ;;  %4772 = vmatprep.mubr.msk.f32.mxu1 %vm345_vm4, %v5860_v61  ;;  %v5994_v32 = vld [vmem:[#allocation2 + $0xe2] sm:$0xff]  ;;  %6833 = vst [vmem:[#allocation38_spill] sm:$0xff] %v6098_v59 }
  0x5d   : > { %4995 = vmatprep.mubr.msk.f32.mxu0 %vm345_vm4, %v5862_v62  ;;  %5090 = vmatprep.subr.msk.mxu0 %vm547_vm3, %v5867_v63  ;;  %v6096_v61 = vld [vmem:[#allocation2 + $0xc0] sm:$0xff] }
  0x5f   : > { %4773 = vmatmul.mubr.msk.f32.gmra.mrb[20].mxu1 %vm345_vm4, %v5877_v0  ;;  %4996 = vmatmul.mubr.msk.f32.gmra.mrb[2].mxu0 %vm345_vm4, %v5879_v1  ;;  %v6094_v0 = vld [vmem:[#allocation2 + $0x172] sm:$0xff] }
  0x60   : > { %4775 = vmatprep.mubr.msk.f32.mxu1 %vm345_vm4, %v5883_v2  ;;  %4998 = vmatprep.mubr.msk.f32.mxu0 %vm345_vm4, %v5885_v3  ;;  %v6092_v2 = vld [vmem:[#allocation2 + $0xb0] sm:$0xff]  ;;  %6832 = vst [vmem:[#allocation37_spill] sm:$0xff] %v6094_v0 }
  0x61   : > { %6831 = vst [vmem:[#allocation36_spill] sm:$0xff] %v6092_v2 }
  0x63   : > { %4776 = vmatmul.mubr.msk.f32.gmra.mrb[22].mxu1 %vm345_vm4, %v5897_v5  ;;  %4999 = vmatmul.mubr.msk.f32.gmra.mrb[4].mxu0 %vm345_vm4, %v5899_v6  ;;  %v6082_v5 = vld [vmem:[#allocation2 + $0x16a] sm:$0xff] }
  0x64   : > { %4778 = vmatprep.mubr.msk.f32.mxu1 %vm345_vm4, %v5901_v7  ;;  %5001 = vmatprep.mubr.msk.f32.mxu0 %vm345_vm4, %v5903_v8  ;;  %v6080_v7 = vld [vmem:[#allocation2 + $0xa8] sm:$0xff] }
  0x67   : > { %4779 = vmatmul.mubr.msk.f32.gmra.mrb[24].mxu1 %vm345_vm4, %v5913_v9  ;;  %5002 = vmatmul.mubr.msk.f32.gmra.mrb[6].mxu0 %vm345_vm4, %v5915_v10  ;;  %v6078_v9 = vld [vmem:[#allocation2 + $0x15a] sm:$0xff] }
  0x68   : > { %4781 = vmatprep.mubr.msk.f32.mxu1 %vm345_vm4, %v5917_v11  ;;  %5004 = vmatprep.mubr.msk.f32.mxu0 %vm345_vm4, %v5919_v12  ;;  %v6076_v11 = vld [vmem:[#allocation2 + $0x98] sm:$0xff] }
  0x69   : > { %6830 = vst [vmem:[#allocation35_spill] sm:$0xff] %v6076_v11 }
  0x6b   : > { %4782 = vmatmul.mubr.msk.f32.gmra.mrb[26].mxu1 %vm345_vm4, %v5929_v13  ;;  %5005 = vmatmul.mubr.msk.f32.gmra.mrb[8].mxu0 %vm345_vm4, %v5931_v14  ;;  %v6066_v13 = vld [vmem:[#allocation2 + $0x152] sm:$0xff] }
  0x6c   : > { %4784 = vmatprep.mubr.msk.f32.mxu1 %vm345_vm4, %v5933_v15  ;;  %5007 = vmatprep.mubr.msk.f32.mxu0 %vm345_vm4, %v5935_v16  ;;  %v6064_v15 = vld [vmem:[#allocation2 + $0x90] sm:$0xff] }
  0x6d   : > { %6829 = vst [vmem:[#allocation34_spill] sm:$0xff] %v6064_v15 }
  0x6f   : > { %4785 = vmatmul.mubr.msk.f32.gmra.mrb[28].mxu1 %vm345_vm4, %v5945_v17  ;;  %5008 = vmatmul.mubr.msk.f32.gmra.mrb[10].mxu0 %vm345_vm4, %v5947_v18  ;;  %v6062_v17 = vld [vmem:[#allocation2 + $0x142] sm:$0xff] }
  0x70   : > { %4787 = vmatprep.mubr.msk.f32.mxu1 %vm345_vm4, %v5949_v19  ;;  %5010 = vmatprep.mubr.msk.f32.mxu0 %vm345_vm4, %v5951_v20  ;;  %v6060_v19 = vld [vmem:[#allocation2 + $0x80] sm:$0xff] }
  0x71   : > { %6828 = vst [vmem:[#allocation33_spill] sm:$0xff] %v6060_v19 }
  0x73   : > { %4788 = vmatmul.mubr.msk.f32.gmra.mrb[30].mxu1 %vm345_vm4, %v5961_v21  ;;  %5011 = vmatmul.mubr.msk.f32.gmra.mrb[12].mxu0 %vm345_vm4, %v5963_v22  ;;  %v6050_v21 = vld [vmem:[#allocation2 + $0x13a] sm:$0xff] }
  0x74   : > { %4792 = vmatprep.mubr.msk.f32.mxu1 %vm345_vm4, %v387_v23  ;;  %5013 = vmatprep.mubr.msk.f32.mxu0 %vm345_vm4, %v5965_v24  ;;  %v6046_v23 = vld [vmem:[#allocation2 + $0x12a] sm:$0xff] }
  0x77   : > { %4793 = vmatmul.mubr.msk.f32.vlgmr.msra.gmra.mrb[0].mxu1 %vm345_vm4, %v388_v25  ;;  %5014 = vmatmul.mubr.msk.f32.gmra.mrb[14].mxu0 %vm345_vm4, %v5974_v26  ;;  %v6048_v25 = vld [vmem:[#allocation2 + $0x78] sm:$0xff] }
  0x78   : > { %4795 = vmatprep.mubr.msk.f32.mxu1 %vm345_vm4, %v5976_v27  ;;  %5016 = vmatprep.mubr.msk.f32.mxu0 %vm345_vm4, %v5978_v28  ;;  %6827 = vst [vmem:[#allocation32_spill] sm:$0xff] %v6048_v25  ;;  %v6112_v27 = vld [vmem:[#allocation2 + $0xd8] sm:$0xff] }
  0x79   : > { %4841 = vmatpush3.msk.msra.mxu1 %vm547_vm3, %v5802_v49  ;;  %v6032_v49 = vld [vmem:[#allocation2 + $0x60] sm:$0xff] }
  0x7a   : > { %4890 = vmatprep.subr.msk.mxu1 %vm547_vm3, %v5986_v29  ;;  %6825 = vst [vmem:[#allocation30_spill] sm:$0xff] %v6032_v49 }
  0x7b   : > { %4796 = vmatmul.mubr.msk.f32.gmra.mrb[2].mxu1 %vm345_vm4, %v5992_v30  ;;  %5017 = vmatmul.mubr.msk.f32.gmra.mrb[16].mxu0 %vm345_vm4, %v5994_v32  ;;  %v6108_v30 = vld [vmem:[#allocation2 + $0xc8] sm:$0xff] }
  0x7c   : > { %4798 = vmatprep.mubr.msk.f32.mxu1 %vm345_vm4, %v5998_v37  ;;  %5019 = vmatprep.mubr.msk.f32.mxu0 %vm345_vm4, %v6000_v38 }
  0x7f   : > { %4799 = vmatmul.mubr.msk.f32.gmra.mrb[4].mxu1 %vm345_vm4, %v6012_v40  ;;  %5020 = vmatmul.mubr.msk.f32.gmra.mrb[18].mxu0 %vm345_vm4, %v6014_v42 }
  0x80   : > { %4801 = vmatprep.mubr.msk.f32.mxu1 %vm345_vm4, %v6016_v43  ;;  %5022 = vmatprep.mubr.msk.f32.mxu0 %vm345_vm4, %v6018_v44 }
  0x83   : > { %4802 = vmatmul.mubr.msk.f32.gmra.mrb[6].mxu1 %vm345_vm4, %v6028_v45  ;;  %5023 = vmatmul.mubr.msk.f32.gmra.mrb[20].mxu0 %vm345_vm4, %v6030_v46 }
  0x84   : > { %4804 = vmatprep.mubr.msk.f32.mxu1 %vm345_vm4, %v6032_v49  ;;  %5025 = vmatprep.mubr.msk.f32.mxu0 %vm345_vm4, %v6034_v57 }
  0x87   : > { %4805 = vmatmul.mubr.msk.f32.gmra.mrb[8].mxu1 %vm345_vm4, %v6044_v58  ;;  %5026 = vmatmul.mubr.msk.f32.gmra.mrb[22].mxu0 %vm345_vm4, %v6046_v23 }
  0x88   : > { %4807 = vmatprep.mubr.msk.f32.mxu1 %vm345_vm4, %v6048_v25  ;;  %5028 = vmatprep.mubr.msk.f32.mxu0 %vm345_vm4, %v6050_v21 }
  0x8b   : > { %4808 = vmatmul.mubr.msk.f32.gmra.mrb[10].mxu1 %vm345_vm4, %v6060_v19  ;;  %5029 = vmatmul.mubr.msk.f32.gmra.mrb[24].mxu0 %vm345_vm4, %v6062_v17 }
  0x8c   : > { %4810 = vmatprep.mubr.msk.f32.mxu1 %vm345_vm4, %v6064_v15  ;;  %5031 = vmatprep.mubr.msk.f32.mxu0 %vm345_vm4, %v6066_v13 }
  0x8f   : > { %4811 = vmatmul.mubr.msk.f32.gmra.mrb[12].mxu1 %vm345_vm4, %v6076_v11  ;;  %5032 = vmatmul.mubr.msk.f32.gmra.mrb[26].mxu0 %vm345_vm4, %v6078_v9 }
  0x90   : > { %4813 = vmatprep.mubr.msk.f32.mxu1 %vm345_vm4, %v6080_v7  ;;  %5034 = vmatprep.mubr.msk.f32.mxu0 %vm345_vm4, %v6082_v5 }
  0x93   : > { %4814 = vmatmul.mubr.msk.f32.gmra.mrb[14].mxu1 %vm345_vm4, %v6092_v2  ;;  %5035 = vmatmul.mubr.msk.f32.gmra.mrb[28].mxu0 %vm345_vm4, %v6094_v0  ;;  %v6129_v0 = vld [vmem:[%s6754_s3 + $0x20] sm:$0xf] }
  0x94   : > { %4816 = vmatprep.mubr.msk.f32.mxu1 %vm345_vm4, %v6096_v61  ;;  %5037 = vmatprep.mubr.msk.f32.mxu0 %vm345_vm4, %v6098_v59  ;;  %v6124_v59 = vld [vmem:[#allocation2 + $0xf0] sm:$0xff] }
  0x97   : > { %4817 = vmatmul.mubr.msk.f32.gmra.mrb[16].mxu1 %vm345_vm4, %v6108_v30  ;;  %5038 = vmatmul.mubr.msk.f32.gmra.mrb[30].mxu0 %vm345_vm4, %v6110_v55  ;;  %v6139_v55 = vld [vmem:[#allocation2 + $0xf8] sm:$0xff] }
  0x98   : > { %4819 = vmatprep.mubr.msk.f32.mxu1 %vm345_vm4, %v6112_v27  ;;  %5042 = vmatprep.mubr.msk.f32.mxu0 %vm345_vm4, %v5998_v37  ;;  %v6143_v37 = vld [vmem:[#allocation2 + $0x108] sm:$0xff] }
  0x9b   : > { %4820 = vmatmul.mubr.msk.f32.gmra.mrb[18].mxu1 %vm345_vm4, %v6122_v54  ;;  %5043 = vmatmul.mubr.msk.f32.vlgmr.msra.gmra.mrb[0].mxu0 %vm345_vm4, %v6012_v40  ;;  %v6169_v40 = vld [vmem:[#allocation2 + $0x138] sm:$0xff] }
  0x9c   : > { %5091 = vmatpush3.msk.msra.mxu0 %vm547_vm3, %v5867_v63  ;;  %4822 = vmatprep.mubr.msk.f32.mxu1 %vm345_vm4, %v6124_v59  ;;  %v6155_v63 = vld [vmem:[#allocation2 + $0x110] sm:$0xff] }
  0x9d   : > { %5045 = vmatprep.mubr.msk.f32.mxu0 %vm345_vm4, %v6016_v43  ;;  %5140 = vmatprep.subr.msk.mxu0 %vm547_vm3, %v6129_v0  ;;  %v6157_v43 = vld [vmem:[#allocation2 + $0x120] sm:$0xff] }
  0x9f   : > { %4823 = vmatmul.mubr.msk.f32.gmra.mrb[20].mxu1 %vm345_vm4, %v6139_v55  ;;  %5046 = vmatmul.mubr.msk.f32.gmra.mrb[2].mxu0 %vm345_vm4, %v6028_v45  ;;  %v6167_v45 = vld [vmem:[#allocation2 + $0x128] sm:$0xff] }
  0xa0   : > { %4825 = vmatprep.mubr.msk.f32.mxu1 %vm345_vm4, %v6143_v37  ;;  %5048 = vmatprep.mubr.msk.f32.mxu0 %vm345_vm4, %v6032_v49  ;;  %v6181_v49 = vld [vmem:[#allocation2 + $0x150] sm:$0xff] }
  0xa3   : > { %4826 = vmatmul.mubr.msk.f32.gmra.mrb[22].mxu1 %vm345_vm4, %v6155_v63  ;;  %5049 = vmatmul.mubr.msk.f32.gmra.mrb[4].mxu0 %vm345_vm4, %v6044_v58  ;;  %v6179_v58 = vld [vmem:[#allocation2 + $0x140] sm:$0xff] }
  0xa4   : > { %4828 = vmatprep.mubr.msk.f32.mxu1 %vm345_vm4, %v6157_v43  ;;  %5051 = vmatprep.mubr.msk.f32.mxu0 %vm345_vm4, %v6048_v25  ;;  %v6193_v25 = vld [vmem:[#allocation2 + $0x168] sm:$0xff] }
  0xa7   : > { %4829 = vmatmul.mubr.msk.f32.gmra.mrb[24].mxu1 %vm345_vm4, %v6167_v45  ;;  %5052 = vmatmul.mubr.msk.f32.gmra.mrb[6].mxu0 %vm345_vm4, %v6060_v19  ;;  %v6191_v19 = vld [vmem:[#allocation2 + $0x158] sm:$0xff] }
  0xa8   : > { %4831 = vmatprep.mubr.msk.f32.mxu1 %vm345_vm4, %v6169_v40  ;;  %5054 = vmatprep.mubr.msk.f32.mxu0 %vm345_vm4, %v6064_v15  ;;  %v1100_v15 = vld [vmem:[#allocation2 + $0x2] sm:$0xff] }
  0xab   : > { %4832 = vmatmul.mubr.msk.f32.gmra.mrb[26].mxu1 %vm345_vm4, %v6179_v58  ;;  %5055 = vmatmul.mubr.msk.f32.gmra.mrb[8].mxu0 %vm345_vm4, %v6076_v11  ;;  %v6203_v11 = vld [vmem:[#allocation2 + $0x170] sm:$0xff] }
  0xac   : > { %4834 = vmatprep.mubr.msk.f32.mxu1 %vm345_vm4, %v6181_v49  ;;  %5057 = vmatprep.mubr.msk.f32.mxu0 %vm345_vm4, %v6080_v7 }
  0xaf   : > { %4835 = vmatmul.mubr.msk.f32.gmra.mrb[28].mxu1 %vm345_vm4, %v6191_v19  ;;  %5058 = vmatmul.mubr.msk.f32.gmra.mrb[10].mxu0 %vm345_vm4, %v6092_v2  ;;  %v1101_v2 = vld [vmem:[#allocation2 + $0xa] sm:$0xff] }
  0xb0   : > { %4837 = vmatprep.mubr.msk.f32.mxu1 %vm345_vm4, %v6193_v25  ;;  %5060 = vmatprep.mubr.msk.f32.mxu0 %vm345_vm4, %v6096_v61 }
  0xb3   : > { %4838 = vmatmul.mubr.msk.f32.gmra.mrb[30].mxu1 %vm345_vm4, %v6203_v11  ;;  %5061 = vmatmul.mubr.msk.f32.gmra.mrb[12].mxu0 %vm345_vm4, %v6108_v30 }
  0xb4   : > { %4842 = vmatprep.mubr.msk.f32.mxu1 %vm345_vm4, %v1100_v15  ;;  %5063 = vmatprep.mubr.msk.f32.mxu0 %vm345_vm4, %v6112_v27  ;;  %v2684_v15 = vld [vmem:[#allocation2 + $0x1a0] sm:$0xff] }
  0xb7   : > { %4843 = vmatmul.mubr.msk.f32.vlgmr.msra.gmra.mrb[0].mxu1 %vm345_vm4, %v1101_v2  ;;  %5064 = vmatmul.mubr.msk.f32.gmra.mrb[14].mxu0 %vm345_vm4, %v6122_v54  ;;  %v2683_v2 = vld [vmem:[#allocation2 + $0x198] sm:$0xff] }
  0xb8   : > { %4845 = vmatprep.mubr.msk.f32.mxu1 %vm345_vm4, %v5842_v56  ;;  %5066 = vmatprep.mubr.msk.f32.mxu0 %vm345_vm4, %v6124_v59  ;;  %v6263_v56 = vld [vmem:[#allocation2 + $0x180] sm:$0xff] }
  0xb9   : > { %4891 = vmatpush3.msk.msra.mxu1 %vm547_vm3, %v5986_v29  ;;  %v6849_v29 = vld [vmem:[#allocation30_spill] sm:$0xff] }
  0xba   : > { %5190 = vmatprep.subr.msk.mxu1 %vm547_vm3, %v5664_v4 }
  0xbb   : > { %4846 = vmatmul.mubr.msk.f32.gmra.mrb[2].mxu1 %vm345_vm4, %v5858_v60  ;;  %5067 = vmatmul.mubr.msk.f32.gmra.mrb[16].mxu0 %vm345_vm4, %v6139_v55  ;;  %v6273_v60 = vld [vmem:[#allocation2 + $0x188] sm:$0xff] }
  0xbc   : > { %4848 = vmatprep.mubr.msk.f32.mxu1 %vm345_vm4, %v5862_v62  ;;  %5069 = vmatprep.mubr.msk.f32.mxu0 %vm345_vm4, %v6143_v37 }
  0xbf   : > { %4849 = vmatmul.mubr.msk.f32.gmra.mrb[4].mxu1 %vm345_vm4, %v5879_v1  ;;  %5070 = vmatmul.mubr.msk.f32.gmra.mrb[18].mxu0 %vm345_vm4, %v6155_v63 }
  0xc0   : > { %4851 = vmatprep.mubr.msk.f32.mxu1 %vm345_vm4, %v5885_v3  ;;  %5072 = vmatprep.mubr.msk.f32.mxu0 %vm345_vm4, %v6157_v43 }
  0xc3   : > { %4852 = vmatmul.mubr.msk.f32.gmra.mrb[6].mxu1 %vm345_vm4, %v5899_v6  ;;  %5073 = vmatmul.mubr.msk.f32.gmra.mrb[20].mxu0 %vm345_vm4, %v6167_v45 }
  0xc4   : > { %4854 = vmatprep.mubr.msk.f32.mxu1 %vm345_vm4, %v5903_v8  ;;  %5075 = vmatprep.mubr.msk.f32.mxu0 %vm345_vm4, %v6169_v40 }
  0xc7   : > { %4855 = vmatmul.mubr.msk.f32.gmra.mrb[8].mxu1 %vm345_vm4, %v5915_v10  ;;  %5076 = vmatmul.mubr.msk.f32.gmra.mrb[22].mxu0 %vm345_vm4, %v6179_v58 }
  0xc8   : > { %4857 = vmatprep.mubr.msk.f32.mxu1 %vm345_vm4, %v5919_v12  ;;  %5078 = vmatprep.mubr.msk.f32.mxu0 %vm345_vm4, %v6181_v49 }
  0xcb   : > { %4858 = vmatmul.mubr.msk.f32.gmra.mrb[10].mxu1 %vm345_vm4, %v5931_v14  ;;  %5079 = vmatmul.mubr.msk.f32.gmra.mrb[24].mxu0 %vm345_vm4, %v6191_v19 }
  0xcc   : > { %4860 = vmatprep.mubr.msk.f32.mxu1 %vm345_vm4, %v5935_v16  ;;  %5081 = vmatprep.mubr.msk.f32.mxu0 %vm345_vm4, %v6193_v25 }
  0xcf   : > { %4861 = vmatmul.mubr.msk.f32.gmra.mrb[12].mxu1 %vm345_vm4, %v5947_v18  ;;  %5082 = vmatmul.mubr.msk.f32.gmra.mrb[26].mxu0 %vm345_vm4, %v6203_v11 }
  0xd0   : > { %4863 = vmatprep.mubr.msk.f32.mxu1 %vm345_vm4, %v5951_v20  ;;  %5084 = vmatprep.mubr.msk.f32.mxu0 %vm345_vm4, %v6263_v56 }
  0xd3   : > { %4864 = vmatmul.mubr.msk.f32.gmra.mrb[14].mxu1 %vm345_vm4, %v5963_v22  ;;  %5085 = vmatmul.mubr.msk.f32.gmra.mrb[28].mxu0 %vm345_vm4, %v6273_v60 }
  0xd4   : > { %4866 = vmatprep.mubr.msk.f32.mxu1 %vm345_vm4, %v5965_v24  ;;  %5087 = vmatprep.mubr.msk.f32.mxu0 %vm345_vm4, %v2683_v2  ;;  %v6851_v2 = vld [vmem:[#allocation31_spill] sm:$0xff] }
  0xd7   : > { %4867 = vmatmul.mubr.msk.f32.gmra.mrb[16].mxu1 %vm345_vm4, %v5974_v26  ;;  %5088 = vmatmul.mubr.msk.f32.gmra.mrb[30].mxu0 %vm345_vm4, %v2684_v15  ;;  %v6852_v15 = vld [vmem:[#allocation17_spill] sm:$0xff] }
  0xd8   : > { %4869 = vmatprep.mubr.msk.f32.mxu1 %vm345_vm4, %v5978_v28  ;;  %5092 = vmatprep.mubr.msk.f32.mxu0 %vm345_vm4, %v5725_v31  ;;  %v6835_v31 = vld [vmem:[#allocation37_spill] sm:$0xff] }
  0xdb   : > { %4870 = vmatmul.mubr.msk.f32.gmra.mrb[18].mxu1 %vm345_vm4, %v5994_v32  ;;  %5093 = vmatmul.mubr.msk.f32.vlgmr.msra.gmra.mrb[0].mxu0 %vm345_vm4, %v5739_v33  ;;  %v6836_v33 = vld [vmem:[#allocation9_spill] sm:$0xff] }
  0xdc   : > { %5141 = vmatpush3.msk.msra.mxu0 %vm547_vm3, %v6129_v0  ;;  %4872 = vmatprep.mubr.msk.f32.mxu1 %vm345_vm4, %v6000_v38  ;;  %v6848_v0 = vld [vmem:[#allocation15_spill] sm:$0xff] }
  0xdd   : > { %5095 = vmatprep.mubr.msk.f32.mxu0 %vm345_vm4, %v5743_v34  ;;  %v6837_v34 = vld [vmem:[#allocation24_spill] sm:$0xff] }
  0xdf   : > { %4873 = vmatmul.mubr.msk.f32.gmra.mrb[20].mxu1 %vm345_vm4, %v6014_v42  ;;  %5096 = vmatmul.mubr.msk.f32.gmra.mrb[2].mxu0 %vm345_vm4, %v5755_v35  ;;  %v6838_v35 = vld [vmem:[#allocation10_spill] sm:$0xff] }
  0xe0   : > { %4875 = vmatprep.mubr.msk.f32.mxu1 %vm345_vm4, %v6018_v44  ;;  %5098 = vmatprep.mubr.msk.f32.mxu0 %vm345_vm4, %v5757_v36  ;;  %v6839_v36 = vld [vmem:[#allocation25_spill] sm:$0xff] }
  0xe3   : > { %4876 = vmatmul.mubr.msk.f32.gmra.mrb[22].mxu1 %vm345_vm4, %v6030_v46  ;;  %5099 = vmatmul.mubr.msk.f32.gmra.mrb[4].mxu0 %vm345_vm4, %v5769_v39  ;;  %v6840_v39 = vld [vmem:[#allocation11_spill] sm:$0xff] }
  0xe4   : > { %4878 = vmatprep.mubr.msk.f32.mxu1 %vm345_vm4, %v6034_v57  ;;  %5101 = vmatprep.mubr.msk.f32.mxu0 %vm345_vm4, %v5774_v41  ;;  %v6841_v41 = vld [vmem:[#allocation26_spill] sm:$0xff] }
  0xe7   : > { %4879 = vmatmul.mubr.msk.f32.gmra.mrb[24].mxu1 %vm345_vm4, %v6046_v23  ;;  %5102 = vmatmul.mubr.msk.f32.gmra.mrb[6].mxu0 %vm345_vm4, %v5793_v47  ;;  %v6842_v47 = vld [vmem:[#allocation12_spill] sm:$0xff] }
  0xe8   : > { %4881 = vmatprep.mubr.msk.f32.mxu1 %vm345_vm4, %v6050_v21  ;;  %5104 = vmatprep.mubr.msk.f32.mxu0 %vm345_vm4, %v5797_v48  ;;  %v6843_v48 = vld [vmem:[#allocation27_spill] sm:$0xff] }
  0xeb   : > { %4882 = vmatmul.mubr.msk.f32.gmra.mrb[26].mxu1 %vm345_vm4, %v6062_v17  ;;  %5105 = vmatmul.mubr.msk.f32.gmra.mrb[8].mxu0 %vm345_vm4, %v5812_v50  ;;  %v6844_v50 = vld [vmem:[#allocation13_spill] sm:$0xff] }
  0xec   : > { %4884 = vmatprep.mubr.msk.f32.mxu1 %vm345_vm4, %v6066_v13  ;;  %5107 = vmatprep.mubr.msk.f32.mxu0 %vm345_vm4, %v5814_v51  ;;  %v6845_v51 = vld [vmem:[#allocation28_spill] sm:$0xff] }
  0xef   : > { %4885 = vmatmul.mubr.msk.f32.gmra.mrb[28].mxu1 %vm345_vm4, %v6078_v9  ;;  %5108 = vmatmul.mubr.msk.f32.gmra.mrb[10].mxu0 %vm345_vm4, %v5826_v52  ;;  %v6846_v52 = vld [vmem:[#allocation14_spill] sm:$0xff] }
  0xf0   : > { %4887 = vmatprep.mubr.msk.f32.mxu1 %vm345_vm4, %v6082_v5  ;;  %5110 = vmatprep.mubr.msk.f32.mxu0 %vm345_vm4, %v5828_v53  ;;  %v6847_v53 = vld [vmem:[#allocation29_spill] sm:$0xff] }
  0xf3   : > { %4888 = vmatmul.mubr.msk.f32.gmra.mrb[30].mxu1 %vm345_vm4, %v6835_v31  ;;  %5111 = vmatmul.mubr.msk.f32.gmra.mrb[12].mxu0 %vm345_vm4, %v6836_v33  ;;  %v6853_v33 = vld [vmem:[#allocation32_spill] sm:$0xff] }
  0xf4   : > { %4892 = vmatprep.mubr.msk.f32.mxu1 %vm345_vm4, %v6837_v34  ;;  %5113 = vmatprep.mubr.msk.f32.mxu0 %vm345_vm4, %v6838_v35  ;;  %v6854_v34 = vld [vmem:[#allocation18_spill] sm:$0xff] }
  0xf7   : > { %4893 = vmatmul.mubr.msk.f32.vlgmr.msra.gmra.mrb[0].mxu1 %vm345_vm4, %v6839_v36  ;;  %5114 = vmatmul.mubr.msk.f32.gmra.mrb[14].mxu0 %vm345_vm4, %v6840_v39  ;;  %v6855_v36 = vld [vmem:[#allocation33_spill] sm:$0xff] }
  0xf8   : > { %4895 = vmatprep.mubr.msk.f32.mxu1 %vm345_vm4, %v6841_v41  ;;  %5116 = vmatprep.mubr.msk.f32.mxu0 %vm345_vm4, %v6842_v47  ;;  %v6856_v41 = vld [vmem:[#allocation19_spill] sm:$0xff] }
  0xf9   : > { %5191 = vmatpush3.msk.msra.mxu1 %vm547_vm3, %v5664_v4  ;;  %v6850_v4 = vld [vmem:[#allocation16_spill] sm:$0xff] }
  0xfb   : > { %4896 = vmatmul.mubr.msk.f32.gmra.mrb[2].mxu1 %vm345_vm4, %v6843_v48  ;;  %5117 = vmatmul.mubr.msk.f32.gmra.mrb[16].mxu0 %vm345_vm4, %v6844_v50  ;;  %v6857_v48 = vld [vmem:[#allocation34_spill] sm:$0xff] }
  0xfc   : > { %4898 = vmatprep.mubr.msk.f32.mxu1 %vm345_vm4, %v6845_v51  ;;  %5119 = vmatprep.mubr.msk.f32.mxu0 %vm345_vm4, %v6846_v52  ;;  %v6858_v51 = vld [vmem:[#allocation20_spill] sm:$0xff] }
  0xff   : > { %4899 = vmatmul.mubr.msk.f32.gmra.mrb[4].mxu1 %vm345_vm4, %v6847_v53  ;;  %5120 = vmatmul.mubr.msk.f32.gmra.mrb[18].mxu0 %vm345_vm4, %v6848_v0  ;;  %v6859_v53 = vld [vmem:[#allocation35_spill] sm:$0xff] }
 0x100   : > { %4901 = vmatprep.mubr.msk.f32.mxu1 %vm345_vm4, %v6849_v29  ;;  %5122 = vmatprep.mubr.msk.f32.mxu0 %vm345_vm4, %v6850_v4  ;;  %v6860_v29 = vld [vmem:[#allocation21_spill] sm:$0xff] }
 0x103   : > { %4902 = vmatmul.mubr.msk.f32.gmra.mrb[6].mxu1 %vm345_vm4, %v6851_v2  ;;  %5123 = vmatmul.mubr.msk.f32.gmra.mrb[20].mxu0 %vm345_vm4, %v6852_v15  ;;  %v6861_v2 = vld [vmem:[#allocation22_spill] sm:$0xff] }
 0x104   : > { %4904 = vmatprep.mubr.msk.f32.mxu1 %vm345_vm4, %v6853_v33  ;;  %5125 = vmatprep.mubr.msk.f32.mxu0 %vm345_vm4, %v6854_v34  ;;  %v6397_v33 = vld [vmem:[#allocation2 + $0x181] sm:$0xff] }
 0x107   : > { %4905 = vmatmul.mubr.msk.f32.gmra.mrb[8].mxu1 %vm345_vm4, %v6855_v36  ;;  %5126 = vmatmul.mubr.msk.f32.gmra.mrb[22].mxu0 %vm345_vm4, %v6856_v41  ;;  %v6862_v36 = vld [vmem:[#allocation36_spill] sm:$0xff] }
 0x108   : > { %4907 = vmatprep.mubr.msk.f32.mxu1 %vm345_vm4, %v6857_v48  ;;  %5128 = vmatprep.mubr.msk.f32.mxu0 %vm345_vm4, %v6858_v51  ;;  %v6863_v48 = vld [vmem:[#allocation23_spill] sm:$0xff] }
 0x10b   : > { %4908 = vmatmul.mubr.msk.f32.gmra.mrb[10].mxu1 %vm345_vm4, %v6859_v53  ;;  %5129 = vmatmul.mubr.msk.f32.gmra.mrb[24].mxu0 %vm345_vm4, %v6860_v29  ;;  %v6407_v53 = vld [vmem:[#allocation2 + $0x189] sm:$0xff] }
 0x10c   : > { %4910 = vmatprep.mubr.msk.f32.mxu1 %vm345_vm4, %v6080_v7  ;;  %5131 = vmatprep.mubr.msk.f32.mxu0 %vm345_vm4, %v6861_v2  ;;  %v3071_v7 = vld [vmem:[#allocation2 + $0x199] sm:$0xff] }
 0x10f   : > { %4911 = vmatmul.mubr.msk.f32.gmra.mrb[12].mxu1 %vm345_vm4, %v6862_v36  ;;  %5132 = vmatmul.mubr.msk.f32.gmra.mrb[26].mxu0 %vm345_vm4, %v6863_v48  ;;  %v3072_v36 = vld [vmem:[#allocation2 + $0x1a1] sm:$0xff] }
 0x110   : > { %4913 = vmatprep.mubr.msk.f32.mxu1 %vm345_vm4, %v6096_v61  ;;  %5134 = vmatprep.mubr.msk.f32.mxu0 %vm345_vm4, %v6397_v33  ;;  %v3460_v61 = vld [vmem:[#allocation2 + $0x1a2] sm:$0xff] }
 0x113   : > { %4914 = vmatmul.mubr.msk.f32.gmra.mrb[14].mxu1 %vm345_vm4, %v6108_v30  ;;  %5135 = vmatmul.mubr.msk.f32.gmra.mrb[28].mxu0 %vm345_vm4, %v6407_v53 }
 0x114   : > { %4916 = vmatprep.mubr.msk.f32.mxu1 %vm345_vm4, %v6112_v27  ;;  %5137 = vmatprep.mubr.msk.f32.mxu0 %vm345_vm4, %v3071_v7 }
 0x117   : > { %4917 = vmatmul.mubr.msk.f32.gmra.mrb[16].mxu1 %vm345_vm4, %v6122_v54  ;;  %5138 = vmatmul.mubr.msk.f32.gmra.mrb[30].mxu0 %vm345_vm4, %v3072_v36  ;;  %v6864_v54 = vld [vmem:[#allocation38_spill] sm:$0xff] }
 0x118   : > { %4919 = vmatprep.mubr.msk.f32.mxu1 %vm345_vm4, %v6124_v59  ;;  %5142 = vmatprep.mubr.msk.f32.mxu0 %vm345_vm4, %v5862_v62  ;;  %v6865_v59 = vld [vmem:[#allocation39_spill] sm:$0xff] }
 0x11b   : > { %4920 = vmatmul.mubr.msk.f32.gmra.mrb[18].mxu1 %vm345_vm4, %v6139_v55  ;;  %5143 = vmatmul.mubr.msk.f32.vlgmr.msra.gmra.mrb[0].mxu0 %vm345_vm4, %v5879_v1  ;;  %v3459_v55 = vld [vmem:[#allocation2 + $0x19a] sm:$0xff] }
 0x11c   : > { %4922 = vmatprep.mubr.msk.f32.mxu1 %vm345_vm4, %v6143_v37  ;;  %5145 = vmatprep.mubr.msk.f32.mxu0 %vm345_vm4, %v5885_v3 }
 0x11f   : > { %4923 = vmatmul.mubr.msk.f32.gmra.mrb[20].mxu1 %vm345_vm4, %v6155_v63  ;;  %5146 = vmatmul.mubr.msk.f32.gmra.mrb[2].mxu0 %vm345_vm4, %v5899_v6 }
 0x120   : > { %4925 = vmatprep.mubr.msk.f32.mxu1 %vm345_vm4, %v6157_v43  ;;  %5148 = vmatprep.mubr.msk.f32.mxu0 %vm345_vm4, %v5903_v8 }
 0x123   : > { %4926 = vmatmul.mubr.msk.f32.gmra.mrb[22].mxu1 %vm345_vm4, %v6167_v45  ;;  %5149 = vmatmul.mubr.msk.f32.gmra.mrb[4].mxu0 %vm345_vm4, %v5915_v10 }
 0x124   : > { %4928 = vmatprep.mubr.msk.f32.mxu1 %vm345_vm4, %v6169_v40  ;;  %5151 = vmatprep.mubr.msk.f32.mxu0 %vm345_vm4, %v5919_v12 }
 0x127   : > { %4929 = vmatmul.mubr.msk.f32.gmra.mrb[24].mxu1 %vm345_vm4, %v6179_v58  ;;  %5152 = vmatmul.mubr.msk.f32.gmra.mrb[6].mxu0 %vm345_vm4, %v5931_v14 }
 0x128   : > { %4931 = vmatprep.mubr.msk.f32.mxu1 %vm345_vm4, %v6181_v49  ;;  %5154 = vmatprep.mubr.msk.f32.mxu0 %vm345_vm4, %v5935_v16 }
 0x12b   : > { %4932 = vmatmul.mubr.msk.f32.gmra.mrb[26].mxu1 %vm345_vm4, %v6191_v19  ;;  %5155 = vmatmul.mubr.msk.f32.gmra.mrb[8].mxu0 %vm345_vm4, %v5947_v18 }
 0x12c   : > { %4934 = vmatprep.mubr.msk.f32.mxu1 %vm345_vm4, %v6193_v25  ;;  %5157 = vmatprep.mubr.msk.f32.mxu0 %vm345_vm4, %v5951_v20 }
 0x12f   : > { %4935 = vmatmul.mubr.msk.f32.gmra.mrb[28].mxu1 %vm345_vm4, %v6203_v11  ;;  %5158 = vmatmul.mubr.msk.f32.gmra.mrb[10].mxu0 %vm345_vm4, %v5963_v22 }
 0x130   : > { %4937 = vmatprep.mubr.msk.f32.mxu1 %vm345_vm4, %v6263_v56  ;;  %5160 = vmatprep.mubr.msk.f32.mxu0 %vm345_vm4, %v5965_v24 }
 0x133   : > { %4938 = vmatmul.mubr.msk.f32.gmra.mrb[30].mxu1 %vm345_vm4, %v6273_v60  ;;  %5161 = vmatmul.mubr.msk.f32.gmra.mrb[12].mxu0 %vm345_vm4, %v5974_v26 }
 0x134   : > { %4966 = vmatprep.mubr.msk.f32.mxu1 %vm345_vm4, %v6838_v35  ;;  %5163 = vmatprep.mubr.msk.f32.mxu0 %vm345_vm4, %v5978_v28 }
 0x137   : > { %4967 = vmatmul.mubr.msk.f32.vlgmr.msra.gmra.mrb[16].mxu1 %vm345_vm4, %v6840_v39  ;;  %5164 = vmatmul.mubr.msk.f32.gmra.mrb[14].mxu0 %vm345_vm4, %v5994_v32 }
 0x138   : > { %4969 = vmatprep.mubr.msk.f32.mxu1 %vm345_vm4, %v6842_v47  ;;  %5166 = vmatprep.mubr.msk.f32.mxu0 %vm345_vm4, %v6000_v38 }
 0x13b   : > { %4970 = vmatmul.mubr.msk.f32.gmra.mrb[18].mxu1 %vm345_vm4, %v6844_v50  ;;  %5167 = vmatmul.mubr.msk.f32.gmra.mrb[16].mxu0 %vm345_vm4, %v6014_v42 }
 0x13c   : > { %4972 = vmatprep.mubr.msk.f32.mxu1 %vm345_vm4, %v6846_v52  ;;  %5169 = vmatprep.mubr.msk.f32.mxu0 %vm345_vm4, %v6018_v44 }
 0x13f   : > { %4973 = vmatmul.mubr.msk.f32.gmra.mrb[20].mxu1 %vm345_vm4, %v6848_v0  ;;  %5170 = vmatmul.mubr.msk.f32.gmra.mrb[18].mxu0 %vm345_vm4, %v6030_v46 }
 0x140   : > { %4975 = vmatprep.mubr.msk.f32.mxu1 %vm345_vm4, %v6850_v4  ;;  %5172 = vmatprep.mubr.msk.f32.mxu0 %vm345_vm4, %v6034_v57 }
 0x143   : > { %4976 = vmatmul.mubr.msk.f32.gmra.mrb[22].mxu1 %vm345_vm4, %v6852_v15  ;;  %5173 = vmatmul.mubr.msk.f32.gmra.mrb[20].mxu0 %vm345_vm4, %v6046_v23 }
 0x144   : > { %4978 = vmatprep.mubr.msk.f32.mxu1 %vm345_vm4, %v6854_v34  ;;  %5175 = vmatprep.mubr.msk.f32.mxu0 %vm345_vm4, %v6050_v21 }
 0x147   : > { %4979 = vmatmul.mubr.msk.f32.gmra.mrb[24].mxu1 %vm345_vm4, %v6856_v41  ;;  %5176 = vmatmul.mubr.msk.f32.gmra.mrb[22].mxu0 %vm345_vm4, %v6062_v17 }
 0x148   : > { %4981 = vmatprep.mubr.msk.f32.mxu1 %vm345_vm4, %v6858_v51  ;;  %5178 = vmatprep.mubr.msk.f32.mxu0 %vm345_vm4, %v6066_v13 }
 0x14b   : > { %4982 = vmatmul.mubr.msk.f32.gmra.mrb[26].mxu1 %vm345_vm4, %v6860_v29  ;;  %5179 = vmatmul.mubr.msk.f32.gmra.mrb[24].mxu0 %vm345_vm4, %v6078_v9 }
 0x14c   : > { %4984 = vmatprep.mubr.msk.f32.mxu1 %vm345_vm4, %v6861_v2  ;;  %5181 = vmatprep.mubr.msk.f32.mxu0 %vm345_vm4, %v6082_v5 }
 0x14f   : > { %4985 = vmatmul.mubr.msk.f32.gmra.mrb[28].mxu1 %vm345_vm4, %v6863_v48  ;;  %5182 = vmatmul.mubr.msk.f32.gmra.mrb[26].mxu0 %vm345_vm4, %v6835_v31 }
 0x150   : > { %4987 = vmatprep.mubr.msk.f32.mxu1 %vm345_vm4, %v6397_v33  ;;  %5184 = vmatprep.mubr.msk.f32.mxu0 %vm345_vm4, %v6864_v54 }
 0x153   : > { %4988 = vmatmul.mubr.msk.f32.gmra.mrb[30].mxu1 %vm345_vm4, %v6407_v53  ;;  %5185 = vmatmul.mubr.msk.f32.gmra.mrb[28].mxu0 %vm345_vm4, %v6865_v59 }
 0x154   : > { %5187 = vmatprep.mubr.msk.f32.mxu0 %vm345_vm4, %v3459_v55 }
 0x157   : > { %5188 = vmatmul.mubr.msk.f32.gmra.mrb[30].mxu0 %vm345_vm4, %v3460_v61 }
 0x1ca   : > { %v4894_v62 = vpop.f32.mrb[0].mxu1 }
 0x1cb   : > { %v1685_v1 = vpop.f32.mrb[1].mxu1 }
 0x1ce   : > { %v4897_v3 = vpop.f32.mrb[2].mxu1 }
 0x1cf   : > { %v1695_v5 = vpop.f32.mrb[3].mxu1 }
 0x1d2   : > { %v4900_v6 = vpop.f32.mrb[4].mxu1 }
 0x1d3   : > { %v1705_v8 = vpop.f32.mrb[5].mxu1 }
 0x1d6   : > { %v4903_v9 = vpop.f32.mrb[6].mxu1 }
 0x1d7   : > { %v1715_v10 = vpop.f32.mrb[7].mxu1 }
 0x1da   : > { %v6541_v11 = vpop.f32.mrb[8].mxu1 }
 0x1db   : > { %v6543_v12 = vpop.f32.mrb[9].mxu1 }
 0x1de   : > { %v6545_v13 = vpop.f32.mrb[10].mxu1 }
 0x1df   : > { %v6547_v14 = vpop.f32.mrb[11].mxu1 }
 0x1e2   : > { %v6549_v16 = vpop.f32.mrb[12].mxu1 }
 0x1e3   : > { %v6551_v17 = vpop.f32.mrb[13].mxu1 }
 0x1e6   : > { %v6553_v18 = vpop.f32.mrb[14].mxu1 }
 0x1e7   : > { %v6555_v19 = vpop.f32.mrb[15].mxu1 }
 0x1ee   : > { %v5144_v20 = vpop.f32.mrb[0].mxu0 }
 0x1ef   : > { %v5192_v21 = vadd.f32 %v5144_v20, %v4894_v62  ;;  %v3626_v22 = vpop.f32.mrb[1].mxu0 }
 0x1f0   : > { %v5193_v24 = vadd.f32 %v3626_v22, %v1685_v1 }
 0x1f1   : > { %3819 = vst.msk [vmem:[%s5597_s28 + $0x8] sm:$0xff] %vm3817_vm5, %v5192_v21  ;;  %v3852_v26 = vsel %vm3817_vm5, %v5192_v21, 0.0  ;;  %v3925_v27 = vmul.f32 %v5192_v21, %v5192_v21 }
 0x1f2   : > { %3818 = vst.msk [vmem:[%s5597_s28] sm:$0xff] %vm3817_vm5, %v5193_v24  ;;  %v3851_v28 = vsel %vm3817_vm5, %v5193_v24, 0.0  ;;  %v3924_v30 = vmul.f32 %v5193_v24, %v5193_v24  ;;  %v5147_v32 = vpop.f32.mrb[2].mxu0 }
 0x1f3   : > { %v3957_v37 = vsel %vm3817_vm5, %v3925_v27, 0.0  ;;  %v3853_v38 = vadd.f32 %v3852_v26, %v3851_v28  ;;  %v5194_v40 = vadd.f32 %v5147_v32, %v4897_v3  ;;  %v3636_v42 = vpop.f32.mrb[3].mxu0 }
 0x1f4   : > { %v3956_v43 = vsel %vm3817_vm5, %v3924_v30, 0.0  ;;  %v5195_v44 = vadd.f32 %v3636_v42, %v1695_v5 }
 0x1f5   : > { %v3958_v45 = vadd.f32 %v3957_v37, %v3956_v43  ;;  %3821 = vst.msk [vmem:[%s5597_s28 + $0x18] sm:$0xff] %vm3817_vm5, %v5194_v40  ;;  %v3927_v46 = vmul.f32 %v5194_v40, %v5194_v40  ;;  %v3856_v56 = vsel %vm3817_vm5, %v5194_v40, 0.0 }
 0x1f6   : > { %3820 = vst.msk [vmem:[%s5597_s28 + $0x10] sm:$0xff] %vm3817_vm5, %v5195_v44  ;;  %v3854_v49 = vsel %vm3817_vm5, %v5195_v44, 0.0  ;;  %v3926_v57 = vmul.f32 %v5195_v44, %v5195_v44  ;;  %v5150_v58 = vpop.f32.mrb[4].mxu0 }
 0x1f7   : > { %v3855_v23 = vadd.f32 %v3854_v49, %v3853_v38  ;;  %v5196_v25 = vadd.f32 %v5150_v58, %v4900_v6  ;;  %v3646_v63 = vpop.f32.mrb[5].mxu0  ;;  %v3961_v47 = vsel %vm3817_vm5, %v3927_v46, 0.0 }
 0x1f8   : > { %v3959_v60 = vsel %vm3817_vm5, %v3926_v57, 0.0  ;;  %v5197_v31 = vadd.f32 %v3646_v63, %v1705_v8 }
 0x1f9   : > { %v3960_v35 = vadd.f32 %v3959_v60, %v3958_v45  ;;  %3823 = vst.msk [vmem:[%s5597_s28 + $0x28] sm:$0xff] %vm3817_vm5, %v5196_v25  ;;  %v3857_v39 = vadd.f32 %v3856_v56, %v3855_v23  ;;  %v3929_v50 = vmul.f32 %v5196_v25, %v5196_v25  ;;  %v3860_v29 = vsel %vm3817_vm5, %v5196_v25, 0.0 }
 0x1fa   : > { %3822 = vst.msk [vmem:[%s5597_s28 + $0x20] sm:$0xff] %vm3817_vm5, %v5197_v31  ;;  %v3858_v52 = vsel %vm3817_vm5, %v5197_v31, 0.0  ;;  %v3928_v0 = vmul.f32 %v5197_v31, %v5197_v31  ;;  %v5153_v4 = vpop.f32.mrb[6].mxu0 }
 0x1fb   : > { %v3859_v15 = vadd.f32 %v3858_v52, %v3857_v39  ;;  %v3962_v34 = vadd.f32 %v3961_v47, %v3960_v35  ;;  %v5198_v41 = vadd.f32 %v5153_v4, %v4903_v9  ;;  %v3656_v51 = vpop.f32.mrb[7].mxu0  ;;  %v3965_v7 = vsel %vm3817_vm5, %v3929_v50, 0.0 }
 0x1fc   : > { %v3963_v2 = vsel %vm3817_vm5, %v3928_v0, 0.0  ;;  %v5199_v33 = vadd.f32 %v3656_v51, %v1715_v10 }
 0x1fd   : > { %v3964_v48 = vadd.f32 %v3963_v2, %v3962_v34  ;;  %3825 = vst.msk [vmem:[%s5597_s28 + $0x38] sm:$0xff] %vm3817_vm5, %v5198_v41  ;;  %v3861_v53 = vadd.f32 %v3860_v29, %v3859_v15  ;;  %v3931_v36 = vmul.f32 %v5198_v41, %v5198_v41  ;;  %v3864_v5 = vsel %vm3817_vm5, %v5198_v41, 0.0 }
 0x1fe   : > { %3824 = vst.msk [vmem:[%s5597_s28 + $0x30] sm:$0xff] %vm3817_vm5, %v5199_v33  ;;  %v3862_v54 = vsel %vm3817_vm5, %v5199_v33, 0.0  ;;  %v3930_v55 = vmul.f32 %v5199_v33, %v5199_v33  ;;  %v5156_v59 = vpop.f32.mrb[8].mxu0 }
 0x1ff   : > { %v3863_v61 = vadd.f32 %v3862_v54, %v3861_v53  ;;  %v3966_v62 = vadd.f32 %v3965_v7, %v3964_v48  ;;  %v5200_v1 = vadd.f32 %v5156_v59, %v6541_v11  ;;  %v3666_v3 = vpop.f32.mrb[9].mxu0  ;;  %v3969_v20 = vsel %vm3817_vm5, %v3931_v36, 0.0 }
 0x200   : > { %v3967_v6 = vsel %vm3817_vm5, %v3930_v55, 0.0  ;;  %v5201_v8 = vadd.f32 %v3666_v3, %v6543_v12 }
 0x201   : > { %v3968_v9 = vadd.f32 %v3967_v6, %v3966_v62  ;;  %3827 = vst.msk [vmem:[%s5597_s28 + $0x48] sm:$0xff] %vm3817_vm5, %v5200_v1  ;;  %v3865_v10 = vadd.f32 %v3864_v5, %v3863_v61  ;;  %v3933_v21 = vmul.f32 %v5200_v1, %v5200_v1  ;;  %v3868_v30 = vsel %vm3817_vm5, %v5200_v1, 0.0 }
 0x202   : > { %3826 = vst.msk [vmem:[%s5597_s28 + $0x40] sm:$0xff] %vm3817_vm5, %v5201_v8  ;;  %v3866_v11 = vsel %vm3817_vm5, %v5201_v8, 0.0  ;;  %v3932_v22 = vmul.f32 %v5201_v8, %v5201_v8  ;;  %v5159_v24 = vpop.f32.mrb[10].mxu0 }
 0x203   : > { %v3867_v26 = vadd.f32 %v3866_v11, %v3865_v10  ;;  %v3970_v27 = vadd.f32 %v3969_v20, %v3968_v9  ;;  %v5202_v28 = vadd.f32 %v5159_v24, %v6545_v13  ;;  %v3676_v12 = vpop.f32.mrb[11].mxu0  ;;  %v3973_v42 = vsel %vm3817_vm5, %v3933_v21, 0.0 }
 0x204   : > { %v3971_v32 = vsel %vm3817_vm5, %v3932_v22, 0.0  ;;  %v5203_v37 = vadd.f32 %v3676_v12, %v6547_v14 }
 0x205   : > { %v3972_v38 = vadd.f32 %v3971_v32, %v3970_v27  ;;  %3829 = vst.msk [vmem:[%s5597_s28 + $0x58] sm:$0xff] %vm3817_vm5, %v5202_v28  ;;  %v3869_v40 = vadd.f32 %v3868_v30, %v3867_v26  ;;  %v3935_v43 = vmul.f32 %v5202_v28, %v5202_v28  ;;  %v3872_v58 = vsel %vm3817_vm5, %v5202_v28, 0.0 }
 0x206   : > { %3828 = vst.msk [vmem:[%s5597_s28 + $0x50] sm:$0xff] %vm3817_vm5, %v5203_v37  ;;  %v3870_v13 = vsel %vm3817_vm5, %v5203_v37, 0.0  ;;  %v3934_v44 = vmul.f32 %v5203_v37, %v5203_v37  ;;  %v5162_v45 = vpop.f32.mrb[12].mxu0 }
 0x207   : > { %v3871_v46 = vadd.f32 %v3870_v13, %v3869_v40  ;;  %v3974_v49 = vadd.f32 %v3973_v42, %v3972_v38  ;;  %v5204_v57 = vadd.f32 %v5162_v45, %v6549_v16  ;;  %v3686_v14 = vpop.f32.mrb[13].mxu0  ;;  %v3977_v60 = vsel %vm3817_vm5, %v3935_v43, 0.0 }
 0x208   : > { %v3975_v23 = vsel %vm3817_vm5, %v3934_v44, 0.0  ;;  %v5205_v25 = vadd.f32 %v3686_v14, %v6551_v17 }
 0x209   : > { %v3976_v63 = vadd.f32 %v3975_v23, %v3974_v49  ;;  %3831 = vst.msk [vmem:[%s5597_s28 + $0x68] sm:$0xff] %vm3817_vm5, %v5204_v57  ;;  %v3873_v56 = vadd.f32 %v3872_v58, %v3871_v46  ;;  %v3937_v31 = vmul.f32 %v5204_v57, %v5204_v57  ;;  %v3876_v15 = vsel %vm3817_vm5, %v5204_v57, 0.0 }
 0x20a   : > { %3830 = vst.msk [vmem:[%s5597_s28 + $0x60] sm:$0xff] %vm3817_vm5, %v5205_v25  ;;  %v3874_v35 = vsel %vm3817_vm5, %v5205_v25, 0.0  ;;  %v3936_v16 = vmul.f32 %v5205_v25, %v5205_v25  ;;  %v4968_v39 = vpop.f32.mrb[16].mxu1  ;;  %v5165_v47 = vpop.f32.mrb[14].mxu0 }
 0x20b   : > { %v3875_v50 = vadd.f32 %v3874_v35, %v3873_v56  ;;  %v3978_v52 = vadd.f32 %v3977_v60, %v3976_v63  ;;  %v5206_v17 = vadd.f32 %v5165_v47, %v6553_v18  ;;  %v2153_v0 = vpop.f32.mrb[17].mxu1  ;;  %v3696_v4 = vpop.f32.mrb[15].mxu0  ;;  %v3981_v2 = vsel %vm3817_vm5, %v3937_v31, 0.0 }
 0x20c   : > { %v3979_v34 = vsel %vm3817_vm5, %v3936_v16, 0.0  ;;  %v5207_v41 = vadd.f32 %v3696_v4, %v6555_v19 }
 0x20d   : > { %v3980_v51 = vadd.f32 %v3979_v34, %v3978_v52  ;;  %3833 = vst.msk [vmem:[%s5597_s28 + $0x78] sm:$0xff] %vm3817_vm5, %v5206_v17  ;;  %v3877_v29 = vadd.f32 %v3876_v15, %v3875_v50  ;;  %v3939_v33 = vmul.f32 %v5206_v17, %v5206_v17  ;;  %v3880_v61 = vsel %vm3817_vm5, %v5206_v17, 0.0 }
 0x20e   : > { %3832 = vst.msk [vmem:[%s5597_s28 + $0x70] sm:$0xff] %vm3817_vm5, %v5207_v41  ;;  %v3878_v18 = vsel %vm3817_vm5, %v5207_v41, 0.0  ;;  %v3938_v48 = vmul.f32 %v5207_v41, %v5207_v41  ;;  %v4971_v53 = vpop.f32.mrb[18].mxu1  ;;  %v5168_v7 = vpop.f32.mrb[16].mxu0 }
 0x20f   : > { %v3879_v36 = vadd.f32 %v3878_v18, %v3877_v29  ;;  %v3982_v54 = vadd.f32 %v3981_v2, %v3980_v51  ;;  %v5208_v55 = vadd.f32 %v5168_v7, %v4968_v39  ;;  %v2163_v19 = vpop.f32.mrb[19].mxu1  ;;  %v3706_v59 = vpop.f32.mrb[17].mxu0  ;;  %v3985_v6 = vsel %vm3817_vm5, %v3939_v33, 0.0 }
 0x210   : > { %v3983_v62 = vsel %vm3817_vm5, %v3938_v48, 0.0  ;;  %v5209_v1 = vadd.f32 %v3706_v59, %v2153_v0 }
 0x211   : > { %v3984_v3 = vadd.f32 %v3983_v62, %v3982_v54  ;;  %3835 = vst.msk [vmem:[%s5597_s28 + $0x88] sm:$0xff] %vm3817_vm5, %v5208_v55  ;;  %v3881_v5 = vadd.f32 %v3880_v61, %v3879_v36  ;;  %v3941_v8 = vmul.f32 %v5208_v55, %v5208_v55  ;;  %v3884_v28 = vsel %vm3817_vm5, %v5208_v55, 0.0 }
 0x212   : > { %3834 = vst.msk [vmem:[%s5597_s28 + $0x80] sm:$0xff] %vm3817_vm5, %v5209_v1  ;;  %v3882_v9 = vsel %vm3817_vm5, %v5209_v1, 0.0  ;;  %v3940_v10 = vmul.f32 %v5209_v1, %v5209_v1  ;;  %v4974_v20 = vpop.f32.mrb[20].mxu1  ;;  %v5171_v21 = vpop.f32.mrb[18].mxu0 }
 0x213   : > { %v3883_v11 = vadd.f32 %v3882_v9, %v3881_v5  ;;  %v3986_v22 = vadd.f32 %v3985_v6, %v3984_v3  ;;  %v5210_v24 = vadd.f32 %v5171_v21, %v4971_v53  ;;  %v2173_v26 = vpop.f32.mrb[21].mxu1  ;;  %v3716_v27 = vpop.f32.mrb[19].mxu0  ;;  %v3989_v38 = vsel %vm3817_vm5, %v3941_v8, 0.0 }
 0x214   : > { %v3987_v12 = vsel %vm3817_vm5, %v3940_v10, 0.0  ;;  %v5211_v30 = vadd.f32 %v3716_v27, %v2163_v19 }
 0x215   : > { %v3988_v32 = vadd.f32 %v3987_v12, %v3986_v22  ;;  %3837 = vst.msk [vmem:[%s5597_s28 + $0x98] sm:$0xff] %vm3817_vm5, %v5210_v24  ;;  %v3885_v37 = vadd.f32 %v3884_v28, %v3883_v11  ;;  %v3943_v40 = vmul.f32 %v5210_v24, %v5210_v24  ;;  %v3888_v58 = vsel %vm3817_vm5, %v5210_v24, 0.0 }
 0x216   : > { %3836 = vst.msk [vmem:[%s5597_s28 + $0x90] sm:$0xff] %vm3817_vm5, %v5211_v30  ;;  %v3886_v42 = vsel %vm3817_vm5, %v5211_v30, 0.0  ;;  %v3942_v43 = vmul.f32 %v5211_v30, %v5211_v30  ;;  %v4977_v13 = vpop.f32.mrb[22].mxu1  ;;  %v5174_v44 = vpop.f32.mrb[20].mxu0 }
 0x217   : > { %v3887_v45 = vadd.f32 %v3886_v42, %v3885_v37  ;;  %v3990_v46 = vadd.f32 %v3989_v38, %v3988_v32  ;;  %v5212_v49 = vadd.f32 %v5174_v44, %v4974_v20  ;;  %v2183_v57 = vpop.f32.mrb[23].mxu1  ;;  %v3726_v14 = vpop.f32.mrb[21].mxu0  ;;  %v3993_v60 = vsel %vm3817_vm5, %v3943_v40, 0.0 }
 0x218   : > { %v3991_v23 = vsel %vm3817_vm5, %v3942_v43, 0.0  ;;  %v5213_v25 = vadd.f32 %v3726_v14, %v2173_v26 }
 0x219   : > { %v3992_v63 = vadd.f32 %v3991_v23, %v3990_v46  ;;  %3839 = vst.msk [vmem:[%s5597_s28 + $0xa8] sm:$0xff] %vm3817_vm5, %v5212_v49  ;;  %v3889_v56 = vadd.f32 %v3888_v58, %v3887_v45  ;;  %v3945_v31 = vmul.f32 %v5212_v49, %v5212_v49  ;;  %v3892_v15 = vsel %vm3817_vm5, %v5212_v49, 0.0 }
 0x21a   : > { %3838 = vst.msk [vmem:[%s5597_s28 + $0xa0] sm:$0xff] %vm3817_vm5, %v5213_v25  ;;  %v3890_v35 = vsel %vm3817_vm5, %v5213_v25, 0.0  ;;  %v3944_v16 = vmul.f32 %v5213_v25, %v5213_v25  ;;  %v4980_v39 = vpop.f32.mrb[24].mxu1  ;;  %v5177_v47 = vpop.f32.mrb[22].mxu0 }
 0x21b   : > { %v3891_v50 = vadd.f32 %v3890_v35, %v3889_v56  ;;  %v3994_v52 = vadd.f32 %v3993_v60, %v3992_v63  ;;  %v5214_v17 = vadd.f32 %v5177_v47, %v4977_v13  ;;  %v2193_v0 = vpop.f32.mrb[25].mxu1  ;;  %v3736_v4 = vpop.f32.mrb[23].mxu0  ;;  %v3997_v2 = vsel %vm3817_vm5, %v3945_v31, 0.0 }
 0x21c   : > { %v3995_v34 = vsel %vm3817_vm5, %v3944_v16, 0.0  ;;  %v5215_v41 = vadd.f32 %v3736_v4, %v2183_v57 }
 0x21d   : > { %v3996_v51 = vadd.f32 %v3995_v34, %v3994_v52  ;;  %3841 = vst.msk [vmem:[%s5597_s28 + $0xb8] sm:$0xff] %vm3817_vm5, %v5214_v17  ;;  %v3893_v29 = vadd.f32 %v3892_v15, %v3891_v50  ;;  %v3947_v33 = vmul.f32 %v5214_v17, %v5214_v17  ;;  %v3896_v61 = vsel %vm3817_vm5, %v5214_v17, 0.0 }
 0x21e   : > { %3840 = vst.msk [vmem:[%s5597_s28 + $0xb0] sm:$0xff] %vm3817_vm5, %v5215_v41  ;;  %v3894_v18 = vsel %vm3817_vm5, %v5215_v41, 0.0  ;;  %v3946_v48 = vmul.f32 %v5215_v41, %v5215_v41  ;;  %v4983_v53 = vpop.f32.mrb[26].mxu1  ;;  %v5180_v7 = vpop.f32.mrb[24].mxu0 }
 0x21f   : > { %v3895_v36 = vadd.f32 %v3894_v18, %v3893_v29  ;;  %v3998_v54 = vadd.f32 %v3997_v2, %v3996_v51  ;;  %v5216_v55 = vadd.f32 %v5180_v7, %v4980_v39  ;;  %v2203_v19 = vpop.f32.mrb[27].mxu1  ;;  %v3746_v59 = vpop.f32.mrb[25].mxu0  ;;  %v4001_v6 = vsel %vm3817_vm5, %v3947_v33, 0.0 }
 0x220   : > { %v3999_v62 = vsel %vm3817_vm5, %v3946_v48, 0.0  ;;  %v5217_v1 = vadd.f32 %v3746_v59, %v2193_v0 }
 0x221   : > { %v4000_v3 = vadd.f32 %v3999_v62, %v3998_v54  ;;  %3843 = vst.msk [vmem:[%s5597_s28 + $0xc8] sm:$0xff] %vm3817_vm5, %v5216_v55  ;;  %v3897_v5 = vadd.f32 %v3896_v61, %v3895_v36  ;;  %v3949_v8 = vmul.f32 %v5216_v55, %v5216_v55  ;;  %v3900_v28 = vsel %vm3817_vm5, %v5216_v55, 0.0 }
 0x222   : > { %3842 = vst.msk [vmem:[%s5597_s28 + $0xc0] sm:$0xff] %vm3817_vm5, %v5217_v1  ;;  %v3898_v9 = vsel %vm3817_vm5, %v5217_v1, 0.0  ;;  %v3948_v10 = vmul.f32 %v5217_v1, %v5217_v1  ;;  %v4986_v20 = vpop.f32.mrb[28].mxu1  ;;  %v5183_v21 = vpop.f32.mrb[26].mxu0 }
 0x223   : > { %v3899_v11 = vadd.f32 %v3898_v9, %v3897_v5  ;;  %v4002_v22 = vadd.f32 %v4001_v6, %v4000_v3  ;;  %v5218_v24 = vadd.f32 %v5183_v21, %v4983_v53  ;;  %v2213_v26 = vpop.f32.mrb[29].mxu1  ;;  %v3756_v27 = vpop.f32.mrb[27].mxu0  ;;  %v4005_v38 = vsel %vm3817_vm5, %v3949_v8, 0.0 }
 0x224   : > { %v4003_v12 = vsel %vm3817_vm5, %v3948_v10, 0.0  ;;  %v5219_v30 = vadd.f32 %v3756_v27, %v2203_v19  ;;  %v3850_v10 = vld [vmem:[#allocation3] sm:$0x1] }
 0x225   : > { %v4004_v32 = vadd.f32 %v4003_v12, %v4002_v22  ;;  %3845 = vst.msk [vmem:[%s5597_s28 + $0xd8] sm:$0xff] %vm3817_vm5, %v5218_v24  ;;  %v3901_v37 = vadd.f32 %v3900_v28, %v3899_v11  ;;  %v3951_v40 = vmul.f32 %v5218_v24, %v5218_v24  ;;  %v3904_v58 = vsel %vm3817_vm5, %v5218_v24, 0.0  ;;  %v3923_v11 = vld [vmem:[#allocation5] sm:$0x1] }
 0x226   : > { %3844 = vst.msk [vmem:[%s5597_s28 + $0xd0] sm:$0xff] %vm3817_vm5, %v5219_v30  ;;  %v3902_v42 = vsel %vm3817_vm5, %v5219_v30, 0.0  ;;  %v3950_v43 = vmul.f32 %v5219_v30, %v5219_v30  ;;  %v4989_v13 = vpop.f32.mrb[30].mxu1  ;;  %v5186_v44 = vpop.f32.mrb[28].mxu0 }
 0x227   : > { %v3903_v45 = vadd.f32 %v3902_v42, %v3901_v37  ;;  %v4006_v46 = vadd.f32 %v4005_v38, %v4004_v32  ;;  %v5220_v49 = vadd.f32 %v5186_v44, %v4986_v20  ;;  %v2223_v57 = vpop.f32.mrb[31].mxu1  ;;  %v3766_v14 = vpop.f32.mrb[29].mxu0  ;;  %v4009_v60 = vsel %vm3817_vm5, %v3951_v40, 0.0 }
 0x228   : > { %v4007_v23 = vsel %vm3817_vm5, %v3950_v43, 0.0  ;;  %v5221_v25 = vadd.f32 %v3766_v14, %v2213_v26 }
 0x229   : > { %v4008_v63 = vadd.f32 %v4007_v23, %v4006_v46  ;;  %3847 = vst.msk [vmem:[%s5597_s28 + $0xe8] sm:$0xff] %vm3817_vm5, %v5220_v49  ;;  %v3905_v56 = vadd.f32 %v3904_v58, %v3903_v45  ;;  %v3953_v31 = vmul.f32 %v5220_v49, %v5220_v49  ;;  %v3908_v0 = vsel %vm3817_vm5, %v5220_v49, 0.0 }
 0x22a   : > { %3846 = vst.msk [vmem:[%s5597_s28 + $0xe0] sm:$0xff] %vm3817_vm5, %v5221_v25  ;;  %v3906_v35 = vsel %vm3817_vm5, %v5221_v25, 0.0  ;;  %v3952_v16 = vmul.f32 %v5221_v25, %v5221_v25  ;;  %v5189_v39 = vpop.f32.mrb[30].mxu0 }
 0x22b   : > { %v3907_v47 = vadd.f32 %v3906_v35, %v3905_v56  ;;  %v4010_v50 = vadd.f32 %v4009_v60, %v4008_v63  ;;  %v5222_v52 = vadd.f32 %v5189_v39, %v4989_v13  ;;  %v3776_v17 = vpop.f32.mrb[31].mxu0  ;;  %v4013_v29 = vsel %vm3817_vm5, %v3953_v31, 0.0 }
 0x22c   : > { %v4011_v4 = vsel %vm3817_vm5, %v3952_v16, 0.0  ;;  %v5223_v15 = vadd.f32 %v3776_v17, %v2223_v57 }
 0x22d   : > { %v4012_v34 = vadd.f32 %v4011_v4, %v4010_v50  ;;  %3849 = vst.msk [vmem:[%s5597_s28 + $0xf8] sm:$0xff] %vm3817_vm5, %v5222_v52  ;;  %v3955_v41 = vmul.f32 %v5222_v52, %v5222_v52  ;;  %v3909_v51 = vadd.f32 %v3908_v0, %v3907_v47  ;;  %v3912_v7 = vsel %vm3817_vm5, %v5222_v52, 0.0 }
 0x22e   : > { %3848 = vst.msk [vmem:[%s5597_s28 + $0xf0] sm:$0xff] %vm3817_vm5, %v5223_v15  ;;  %v3910_v2 = vsel %vm3817_vm5, %v5223_v15, 0.0  ;;  %v3954_v33 = vmul.f32 %v5223_v15, %v5223_v15  ;;  %s5477_s28 = scalar_lea.vmem %s4043_s24, 32 }
 0x22f   : > { %v4017_v18 = vsel %vm3817_vm5, %v3955_v41, 0.0  ;;  %v3911_v48 = vadd.f32 %v3910_v2, %v3909_v51  ;;  %v4014_v53 = vadd.f32 %v4013_v29, %v4012_v34  ;;  %p5479_p10 = scmp.lt.s32.totalorder %s5477_s28, %s5471_s27 }
 0x230   : > { %v4015_v36 = vsel %vm3817_vm5, %v3954_v33, 0.0 }
 0x231   : > { %v3913_v54 = vadd.f32 %v3912_v7, %v3911_v48  ;;  %v4016_v55 = vadd.f32 %v4015_v36, %v4014_v53  ;;  %p5480_p11 = por %p5479_p10, %p5478_p9 }
 0x233   : > { %v3914_v19 = vrot.slane %v3913_v54, 4  ;;  %v4018_v59 = vadd.f32 %v4017_v18, %v4016_v55  ;;  %p5481_p12 = pnand %p5480_p11, %p5474_p8 }
 0x235   : > { %v3915_v61 = vadd.f32 %v3914_v19, %v3913_v54  ;;  %v4019_v62 = vrot.slane %v4018_v59, 4 }
 0x237   : > { %v3916_v1 = vrot.slane %v3915_v61, 2  ;;  %v4020_v3 = vadd.f32 %v4019_v62, %v4018_v59 }
 0x239   : > { %v3917_v5 = vadd.f32 %v3916_v1, %v3915_v61  ;;  %v4021_v6 = vrot.slane %v4020_v3, 2 }
 0x23b   : > { %v3918_v8 = vrot.slane %v3917_v5, 1  ;;  %v4022_v9 = vadd.f32 %v4021_v6, %v4020_v3 }
 0x23d   : > { %v3919_v20 = vadd.f32 %v3918_v8, %v3917_v5  ;;  %v4023_v21 = vrot.slane %v4022_v9, 1 }
 0x23f   : > { %v3920_v22 = vadd.f32 %v3919_v20, %v3850_v10  ;;  %v4024_v24 = vadd.f32 %v4023_v21, %v4022_v9 }
 0x241   : > { %3922 = vst.msk [vmem:[#allocation3] sm:$0x1] %vm3921_vm6, %v3920_v22  ;;  %v4025_v26 = vadd.f32 %v4024_v24, %v3923_v11 }
 0x242   : > { %5484 = shalt.err (!%p5481_p12)
}
 0x243   : > { %s5485_s7 = scalar_lea.hbm %s6756_s5, 16 }
 0x244   : > { %p5486_p13 = scmp.ne.s32.totalorder %s6756_s5, %s5485_s7  ;;  %p5491_p2 = scmp.lt.u32.totalorder %s5485_s7, %s6756_s5 }
 0x246   : > { %p5487_p0 = pnand %p5486_p13, %p5456_p5 }
 0x248   : > { %p5488_p1 = pneg %p5487_p0 }
 0x24a   : > { %p5493_p3 = pnand %p5491_p2, %p5488_p1 }
 0x24c   : > { %5496 = shalt.err (!%p5493_p3)
}
 0x24d   : > { %5449 = dma.vmem_to_hbm [thread:$0]  (%p5456_p5), %s4043_s24, 16, %s6756_s5, [#allocation4]   ;;  %4026 = vst.msk [vmem:[#allocation5] sm:$0x1] %vm3921_vm6, %v4025_v26 }
 0x24e   : > { %s5497_s14 = scalar_lea.vmem %s6695_s26, 16  ;;  %s5503_s15 = scalar_lea.vmem %s6695_s26, 32 }
 0x24f   : > { %p5498_p4 = scmp.ne.s32.totalorder %s6695_s26, %s5497_s14  ;;  %p5504_p8 = scmp.lt.s32.totalorder %s6695_s26, %s6695_s26 }
 0x250   : > { %p5505_p9 = scmp.lt.s32.totalorder %s5503_s15, %s5497_s14 }
 0x251   : > { %p5499_p6 = pnand %p5498_p4, %p5456_p5 }
 0x252   : > { %p5506_p10 = por %p5505_p9, %p5504_p8 }
 0x253   : > { %p5500_p7 = pneg %p5499_p6 }
 0x255   : > { %p5507_p11 = pnand %p5506_p10, %p5500_p7 }
 0x257   : > { %5510 = shalt.err (!%p5507_p11)
}
 0x258   : > { %s5511_s18 = scalar_lea.hbm %s6757_s6, 16 }
 0x259   : > { %p5512_p12 = scmp.ne.s32.totalorder %s6757_s6, %s5511_s18  ;;  %p5517_p1 = scmp.lt.u32.totalorder %s5511_s18, %s6757_s6 }
 0x25b   : > { %p5513_p13 = pnand %p5512_p12, %p5456_p5 }
 0x25d   : > { %p5514_p0 = pneg %p5513_p13 }
 0x25f   : > { %p5519_p2 = pnand %p5517_p1, %p5514_p0 }
 0x261   : > { %5522 = shalt.err (!%p5519_p2)
}
 0x262   : > { %5451 = dma.vmem_to_hbm [thread:$0]  (%p5456_p5), %s6695_s26, 16, %s6757_s6, [#allocation6]  }
 0x263   : > { %5528 = dma.done.wait (%p5456_p5), [#allocation4], 16  }
 0x264   : > { %5530 = vsyncadd (%p5456_p5), [#allocation4], 4294967280 }
 0x265   : > { %5532 = dma.done.wait (%p5456_p5), [#allocation6], 16  }
 0x266   : > { %5534 = vsyncadd (%p5456_p5), [#allocation6], 4294967280 }
 0x267 PF: > { %s19_s21 = sadd.s32 1, %s5537_s21  }
 0x268   : > { %p16_p3 = scmp.ge.s32.totalorder %s19_s21, 4  }
 0x26a   :  { %18 = sbr.rel (!%p16_p3) target bundleno = 2 (0x2), region = 89 }
 0x271   :  { %4078 = vsyncpa [#allocation4], 1 }
 0x272   :  { %4080 = vsyncpa [#allocation4 + $0x1], 1 }
 0x273   :  { %4081 = vsyncpa [#allocation6], 1 }

</bundles_post_ra>
